<compile_context>
chip_gen: v6e
topology: v6e:2x2x1
jax: 0.10.0
libtpu: 0.0.40
codegen_flags: <defaults>
</compile_context>

<pallas_src>
import functools

import jax
import jax.numpy as jnp
from jax.experimental import pallas as pl
from jax.experimental.pallas import tpu as pltpu


def _gate_update(gates, c_prev, H):
    """gates: (Bp, 4H) in PyTorch order i,f,g,o.  Full-vreg nonlinearities."""
    sg = jax.nn.sigmoid(gates)      # one EUP pass over the whole vreg
    th = jnp.tanh(gates)            # one EUP pass over the whole vreg
    i = sg[:, 0 * H:1 * H]
    f = sg[:, 1 * H:2 * H]
    g = th[:, 2 * H:3 * H]
    o = sg[:, 3 * H:4 * H]
    c_new = f * c_prev + i * g
    h_new = o * jnp.tanh(c_new)
    return h_new, c_new


def lstm_fc_kernel(
    x_ref,        # (S*Bp, I)   seq-major flattened, batch padded to Bp
    w_ih1_ref,    # (I, 4H)
    w_hh1_ref,    # (H, 4H)
    b1_ref,       # (1, 4H)     b_ih_l0 + b_hh_l0
    w2_ref,       # (2H, 4H)    [W_ih_l1^T ; W_hh_l1^T] stacked along K
    b2_ref,       # (1, 4H)     b_ih_l1 + b_hh_l1
    w_fc_ref,     # (H, O)
    b_fc_ref,     # (1, O)
    o_ref,        # (S*Bp, O)
    *,
    seq_len,
    batch_pad,
    hidden,
):
    S, Bp, H = seq_len, batch_pad, hidden

    # ---------- hoisted, non-recurrent work (off the serial chain) ----------
    # Layer-1 input projection for ALL timesteps in one MXU pass, bias folded in.
    xw1 = (
        jnp.dot(x_ref[...], w_ih1_ref[...], preferred_element_type=jnp.float32)
        + b1_ref[...]
    )                                                         # (S*Bp, 4H)
    w_hh1 = w_hh1_ref[...]                                    # (H, 4H)
    w2 = w2_ref[...]                                          # (2H, 4H)
    b2 = jnp.broadcast_to(b2_ref[...], (Bp, 4 * H))           # hoisted broadcast

    h1 = jnp.zeros((Bp, H), jnp.float32)
    c1 = jnp.zeros((Bp, H), jnp.float32)
    h2 = jnp.zeros((Bp, H), jnp.float32)
    c2 = jnp.zeros((Bp, H), jnp.float32)

    # ---------- fully-unrolled time loop (static, vreg-aligned slices) ----------
    h2_steps = []
    for t in range(S):
        # layer 1: only the recurrent matmul sits on the serial chain
        g1 = xw1[t * Bp:(t + 1) * Bp, :] + jnp.dot(
            h1, w_hh1, preferred_element_type=jnp.float32)
        h1, c1 = _gate_update(g1, c1, H)

        # layer 2: fused [x=h1 , h=h2] @ [W_ih2^T ; W_hh2^T]  (one MXU push)
        g2 = jnp.dot(
            jnp.concatenate([h1, h2], axis=-1), w2,
            preferred_element_type=jnp.float32) + b2
        h2, c2 = _gate_update(g2, c2, H)
        h2_steps.append(h2)

    # ---------- final fc, batched over all timesteps: one matmul, one store ----------
    h2_seq = jnp.concatenate(h2_steps, axis=0)                # (S*Bp, H)
    out = jnp.dot(h2_seq, w_fc_ref[...],
                  preferred_element_type=jnp.float32) + b_fc_ref[...]
    o_ref[...] = out.astype(o_ref.dtype)


def lstm_module_forward(x, params):
    """Pallas forward equivalent of LSTM_Module.forward.  x: (S, B, I) f32."""
    S, B, I = x.shape
    H = params["w_hh_l0"].shape[1]
    O = params["w_fc"].shape[0]
    Bp = ((B + 7) // 8) * 8          # pad batch to a full f32 sublane group

    # ---- weight prep: layout plumbing in plain JAX (runs once under jit) ----
    w_ih1_t = params["w_ih_l0"].T                           # (I, 4H)
    w_hh1_t = params["w_hh_l0"].T                           # (H, 4H)
    b1 = (params["b_ih_l0"] + params["b_hh_l0"]).reshape(1, 4 * H)
    w2_t = jnp.concatenate(
        [params["w_ih_l1"].T, params["w_hh_l1"].T], axis=0)  # (2H, 4H)
    b2 = (params["b_ih_l1"] + params["b_hh_l1"]).reshape(1, 4 * H)
    w_fc_t = params["w_fc"].T                               # (H, O)
    b_fc = params["b_fc"].reshape(1, O)

    # pad batch with zero rows (discarded after the kernel), flatten seq-major
    x_p = jnp.pad(x, ((0, 0), (0, Bp - B), (0, 0))).reshape(S * Bp, I)

    kernel = functools.partial(
        lstm_fc_kernel, seq_len=S, batch_pad=Bp, hidden=H)

    vmem_spec = lambda: pl.BlockSpec(memory_space=pltpu.MemorySpace.VMEM)
    out_flat = pl.pallas_call(
        kernel,
        out_shape=jax.ShapeDtypeStruct((S * Bp, O), jnp.float32),
        in_specs=[vmem_spec() for _ in range(8)],
        out_specs=vmem_spec(),
    )(x_p, w_ih1_t, w_hh1_t, b1, w2_t, b2, w_fc_t, b_fc)

    return out_flat.reshape(S, Bp, O)[:, :B, :]


def lstm_module_reference(x, params):
    """Pure-JAX reference mirroring PyTorch nn.LSTM(num_layers=2) + nn.Linear."""

    def run_layer(x_seq, w_ih, w_hh, b_ih, b_hh):
        H = w_hh.shape[1]
        B = x_seq.shape[1]

        def step(carry, xt):
            h, c = carry
            gates = xt @ w_ih.T + b_ih + h @ w_hh.T + b_hh
            i, f, g, o = jnp.split(gates, 4, axis=-1)
            i = jax.nn.sigmoid(i)
            f = jax.nn.sigmoid(f)
            g = jnp.tanh(g)
            o = jax.nn.sigmoid(o)
            c = f * c + i * g
            h = o * jnp.tanh(c)
            return (h, c), h

        init = (jnp.zeros((B, H), jnp.float32), jnp.zeros((B, H), jnp.float32))
        _, hs = jax.lax.scan(step, init, x_seq)
        return hs

    h1 = run_layer(x, params["w_ih_l0"], params["w_hh_l0"],
                   params["b_ih_l0"], params["b_hh_l0"])
    h2 = run_layer(h1, params["w_ih_l1"], params["w_hh_l1"],
                   params["b_ih_l1"], params["b_hh_l1"])
    S, B, H = h2.shape
    y = h2.reshape(S * B, H) @ params["w_fc"].T + params["b_fc"]
    return y.reshape(S, B, -1)


def init_params(key, input_size, hidden_size, output_size, num_layers=2):
    """Deterministic init matching PyTorch shapes (uniform(-1/sqrt(H), 1/sqrt(H)))."""
    k = 1.0 / jnp.sqrt(hidden_size)
    names_shapes = []
    for layer in range(num_layers):
        in_sz = input_size if layer == 0 else hidden_size
        names_shapes += [
            (f"w_ih_l{layer}", (4 * hidden_size, in_sz)),
            (f"w_hh_l{layer}", (4 * hidden_size, hidden_size)),
            (f"b_ih_l{layer}", (4 * hidden_size,)),
            (f"b_hh_l{layer}", (4 * hidden_size,)),
        ]
    names_shapes += [("w_fc", (output_size, hidden_size)),
                     ("b_fc", (output_size,))]
    keys = jax.random.split(key, len(names_shapes))
    params = {}
    for (name, shape), kk in zip(names_shapes, keys):
        params[name] = jax.random.uniform(kk, shape, jnp.float32, -k, k)
    return params


if __name__ == "__main__":
    SEQ, BATCH = 8, 2
    INPUT_SIZE, HIDDEN_SIZE, OUTPUT_SIZE = 4, 32, 1

    key = jax.random.PRNGKey(0)
    k_x, k_p = jax.random.split(key)
    x = jax.random.normal(k_x, (SEQ, BATCH, INPUT_SIZE), jnp.float32)
    params = init_params(k_p, INPUT_SIZE, HIDDEN_SIZE, OUTPUT_SIZE, num_layers=2)

    fwd = jax.jit(lstm_module_forward)
    y = fwd(x, params)
    y = jax.block_until_ready(y)

    y_ref = lstm_module_reference(x, params)
    assert y.shape == (SEQ, BATCH, OUTPUT_SIZE), y.shape
    assert jnp.allclose(y, y_ref, atol=1e-5, rtol=1e-5), float(jnp.max(jnp.abs(y - y_ref)))

    print("KERNEL_OK")
</pallas_src>

<mosaic_0001>
module attributes {stable_mosaic.version = 11 : i64} {
  func.func @lstm_fc_kernel(%arg0: memref<64x4xf32, #tpu.memory_space<vmem>>, %arg1: memref<4x128xf32, #tpu.memory_space<vmem>>, %arg2: memref<32x128xf32, #tpu.memory_space<vmem>>, %arg3: memref<1x128xf32, #tpu.memory_space<vmem>>, %arg4: memref<64x128xf32, #tpu.memory_space<vmem>>, %arg5: memref<1x128xf32, #tpu.memory_space<vmem>>, %arg6: memref<32x1xf32, #tpu.memory_space<vmem>>, %arg7: memref<1x1xf32, #tpu.memory_space<vmem>>, %arg8: memref<64x1xf32, #tpu.memory_space<vmem>>) attributes {dimension_semantics = [], scalar_prefetch = 0 : i64, scratch_operands = 0 : i64, tpu.core_type = #tpu.core_type<tc>} {
    %c0 = arith.constant 0 : index
    %c0_0 = arith.constant 0 : index
    %0 = vector.load %arg0[%c0, %c0_0] : memref<64x4xf32, #tpu.memory_space<vmem>>, vector<64x4xf32>
    %c0_1 = arith.constant 0 : index
    %c0_2 = arith.constant 0 : index
    %1 = vector.load %arg1[%c0_1, %c0_2] : memref<4x128xf32, #tpu.memory_space<vmem>>, vector<4x128xf32>
    %cst = arith.constant dense<0.000000e+00> : vector<64x128xf32>
    %2 = tpu.matmul %0, %1, %cst {dimension_numbers = #tpu.dot_dimension_numbers<[1], [0], [0], [1], [0, 0, 1, 1], [], []>} : vector<64x4xf32>, vector<4x128xf32>, vector<64x128xf32> -> vector<64x128xf32>
    %c0_3 = arith.constant 0 : index
    %c0_4 = arith.constant 0 : index
    %3 = vector.load %arg3[%c0_3, %c0_4] : memref<1x128xf32, #tpu.memory_space<vmem>>, vector<1x128xf32>
    %4 = vector.broadcast %3 : vector<1x128xf32> to vector<64x128xf32>
    %5 = arith.addf %2, %4 : vector<64x128xf32>
    %c0_5 = arith.constant 0 : index
    %c0_6 = arith.constant 0 : index
    %6 = vector.load %arg2[%c0_5, %c0_6] : memref<32x128xf32, #tpu.memory_space<vmem>>, vector<32x128xf32>
    %c0_7 = arith.constant 0 : index
    %c0_8 = arith.constant 0 : index
    %7 = vector.load %arg4[%c0_7, %c0_8] : memref<64x128xf32, #tpu.memory_space<vmem>>, vector<64x128xf32>
    %c0_9 = arith.constant 0 : index
    %c0_10 = arith.constant 0 : index
    %8 = vector.load %arg5[%c0_9, %c0_10] : memref<1x128xf32, #tpu.memory_space<vmem>>, vector<1x128xf32>
    %9 = vector.shape_cast %8 : vector<1x128xf32> to vector<1x128xf32>
    %10 = vector.broadcast %9 : vector<1x128xf32> to vector<8x128xf32>
    %cst_11 = arith.constant 0.000000e+00 : f32
    %11 = vector.broadcast %cst_11 : f32 to vector<8x32xf32>
    %cst_12 = arith.constant 0.000000e+00 : f32
    %12 = vector.broadcast %cst_12 : f32 to vector<8x32xf32>
    %cst_13 = arith.constant 0.000000e+00 : f32
    %13 = vector.broadcast %cst_13 : f32 to vector<8x32xf32>
    %cst_14 = arith.constant 0.000000e+00 : f32
    %14 = vector.broadcast %cst_14 : f32 to vector<8x32xf32>
    %15 = vector.extract_strided_slice %5 {offsets = [0, 0], sizes = [8, 128], strides = [1, 1]} : vector<64x128xf32> to vector<8x128xf32>
    %cst_15 = arith.constant dense<0.000000e+00> : vector<8x128xf32>
    %16 = tpu.matmul %11, %6, %cst_15 {dimension_numbers = #tpu.dot_dimension_numbers<[1], [0], [0], [1], [0, 0, 1, 1], [], []>} : vector<8x32xf32>, vector<32x128xf32>, vector<8x128xf32> -> vector<8x128xf32>
    %17 = arith.addf %15, %16 : vector<8x128xf32>
    %18 = arith.negf %17 : vector<8x128xf32>
    %19 = math.exp %18 : vector<8x128xf32>
    %cst_16 = arith.constant 1.000000e+00 : f32
    %20 = vector.broadcast %cst_16 : f32 to vector<8x128xf32>
    %21 = arith.addf %20, %19 : vector<8x128xf32>
    %22 = arith.divf %20, %21 : vector<8x128xf32>
    %23 = math.tanh %17 : vector<8x128xf32>
    %24 = vector.extract_strided_slice %22 {offsets = [0, 0], sizes = [8, 32], strides = [1, 1]} : vector<8x128xf32> to vector<8x32xf32>
    %25 = vector.extract_strided_slice %22 {offsets = [0, 32], sizes = [8, 32], strides = [1, 1]} : vector<8x128xf32> to vector<8x32xf32>
    %26 = vector.extract_strided_slice %23 {offsets = [0, 64], sizes = [8, 32], strides = [1, 1]} : vector<8x128xf32> to vector<8x32xf32>
    %27 = vector.extract_strided_slice %22 {offsets = [0, 96], sizes = [8, 32], strides = [1, 1]} : vector<8x128xf32> to vector<8x32xf32>
    %28 = arith.mulf %25, %12 : vector<8x32xf32>
    %29 = arith.mulf %24, %26 : vector<8x32xf32>
    %30 = arith.addf %28, %29 : vector<8x32xf32>
    %31 = math.tanh %30 : vector<8x32xf32>
    %32 = arith.mulf %27, %31 : vector<8x32xf32>
    %33 = tpu.concatenate %32, %13 in 1 : vector<8x32xf32>, vector<8x32xf32> -> vector<8x64xf32>
    %cst_17 = arith.constant dense<0.000000e+00> : vector<8x128xf32>
    %34 = tpu.matmul %33, %7, %cst_17 {dimension_numbers = #tpu.dot_dimension_numbers<[1], [0], [0], [1], [0, 0, 1, 1], [], []>} : vector<8x64xf32>, vector<64x128xf32>, vector<8x128xf32> -> vector<8x128xf32>
    %35 = arith.addf %34, %10 : vector<8x128xf32>
    %36 = arith.negf %35 : vector<8x128xf32>
    %37 = math.exp %36 : vector<8x128xf32>
    %cst_18 = arith.constant 1.000000e+00 : f32
    %38 = vector.broadcast %cst_18 : f32 to vector<8x128xf32>
    %39 = arith.addf %38, %37 : vector<8x128xf32>
    %40 = arith.divf %38, %39 : vector<8x128xf32>
    %41 = math.tanh %35 : vector<8x128xf32>
    %42 = vector.extract_strided_slice %40 {offsets = [0, 0], sizes = [8, 32], strides = [1, 1]} : vector<8x128xf32> to vector<8x32xf32>
    %43 = vector.extract_strided_slice %40 {offsets = [0, 32], sizes = [8, 32], strides = [1, 1]} : vector<8x128xf32> to vector<8x32xf32>
    %44 = vector.extract_strided_slice %41 {offsets = [0, 64], sizes = [8, 32], strides = [1, 1]} : vector<8x128xf32> to vector<8x32xf32>
    %45 = vector.extract_strided_slice %40 {offsets = [0, 96], sizes = [8, 32], strides = [1, 1]} : vector<8x128xf32> to vector<8x32xf32>
    %46 = arith.mulf %43, %14 : vector<8x32xf32>
    %47 = arith.mulf %42, %44 : vector<8x32xf32>
    %48 = arith.addf %46, %47 : vector<8x32xf32>
    %49 = math.tanh %48 : vector<8x32xf32>
    %50 = arith.mulf %45, %49 : vector<8x32xf32>
    %51 = vector.extract_strided_slice %5 {offsets = [8, 0], sizes = [8, 128], strides = [1, 1]} : vector<64x128xf32> to vector<8x128xf32>
    %cst_19 = arith.constant dense<0.000000e+00> : vector<8x128xf32>
    %52 = tpu.matmul %32, %6, %cst_19 {dimension_numbers = #tpu.dot_dimension_numbers<[1], [0], [0], [1], [0, 0, 1, 1], [], []>} : vector<8x32xf32>, vector<32x128xf32>, vector<8x128xf32> -> vector<8x128xf32>
    %53 = arith.addf %51, %52 : vector<8x128xf32>
    %54 = arith.negf %53 : vector<8x128xf32>
    %55 = math.exp %54 : vector<8x128xf32>
    %cst_20 = arith.constant 1.000000e+00 : f32
    %56 = vector.broadcast %cst_20 : f32 to vector<8x128xf32>
    %57 = arith.addf %56, %55 : vector<8x128xf32>
    %58 = arith.divf %56, %57 : vector<8x128xf32>
    %59 = math.tanh %53 : vector<8x128xf32>
    %60 = vector.extract_strided_slice %58 {offsets = [0, 0], sizes = [8, 32], strides = [1, 1]} : vector<8x128xf32> to vector<8x32xf32>
    %61 = vector.extract_strided_slice %58 {offsets = [0, 32], sizes = [8, 32], strides = [1, 1]} : vector<8x128xf32> to vector<8x32xf32>
    %62 = vector.extract_strided_slice %59 {offsets = [0, 64], sizes = [8, 32], strides = [1, 1]} : vector<8x128xf32> to vector<8x32xf32>
    %63 = vector.extract_strided_slice %58 {offsets = [0, 96], sizes = [8, 32], strides = [1, 1]} : vector<8x128xf32> to vector<8x32xf32>
    %64 = arith.mulf %61, %30 : vector<8x32xf32>
    %65 = arith.mulf %60, %62 : vector<8x32xf32>
    %66 = arith.addf %64, %65 : vector<8x32xf32>
    %67 = math.tanh %66 : vector<8x32xf32>
    %68 = arith.mulf %63, %67 : vector<8x32xf32>
    %69 = tpu.concatenate %68, %50 in 1 : vector<8x32xf32>, vector<8x32xf32> -> vector<8x64xf32>
    %cst_21 = arith.constant dense<0.000000e+00> : vector<8x128xf32>
    %70 = tpu.matmul %69, %7, %cst_21 {dimension_numbers = #tpu.dot_dimension_numbers<[1], [0], [0], [1], [0, 0, 1, 1], [], []>} : vector<8x64xf32>, vector<64x128xf32>, vector<8x128xf32> -> vector<8x128xf32>
    %71 = arith.addf %70, %10 : vector<8x128xf32>
    %72 = arith.negf %71 : vector<8x128xf32>
    %73 = math.exp %72 : vector<8x128xf32>
    %cst_22 = arith.constant 1.000000e+00 : f32
    %74 = vector.broadcast %cst_22 : f32 to vector<8x128xf32>
    %75 = arith.addf %74, %73 : vector<8x128xf32>
    %76 = arith.divf %74, %75 : vector<8x128xf32>
    %77 = math.tanh %71 : vector<8x128xf32>
    %78 = vector.extract_strided_slice %76 {offsets = [0, 0], sizes = [8, 32], strides = [1, 1]} : vector<8x128xf32> to vector<8x32xf32>
    %79 = vector.extract_strided_slice %76 {offsets = [0, 32], sizes = [8, 32], strides = [1, 1]} : vector<8x128xf32> to vector<8x32xf32>
    %80 = vector.extract_strided_slice %77 {offsets = [0, 64], sizes = [8, 32], strides = [1, 1]} : vector<8x128xf32> to vector<8x32xf32>
    %81 = vector.extract_strided_slice %76 {offsets = [0, 96], sizes = [8, 32], strides = [1, 1]} : vector<8x128xf32> to vector<8x32xf32>
    %82 = arith.mulf %79, %48 : vector<8x32xf32>
    %83 = arith.mulf %78, %80 : vector<8x32xf32>
    %84 = arith.addf %82, %83 : vector<8x32xf32>
    %85 = math.tanh %84 : vector<8x32xf32>
    %86 = arith.mulf %81, %85 : vector<8x32xf32>
    %87 = vector.extract_strided_slice %5 {offsets = [16, 0], sizes = [8, 128], strides = [1, 1]} : vector<64x128xf32> to vector<8x128xf32>
    %cst_23 = arith.constant dense<0.000000e+00> : vector<8x128xf32>
    %88 = tpu.matmul %68, %6, %cst_23 {dimension_numbers = #tpu.dot_dimension_numbers<[1], [0], [0], [1], [0, 0, 1, 1], [], []>} : vector<8x32xf32>, vector<32x128xf32>, vector<8x128xf32> -> vector<8x128xf32>
    %89 = arith.addf %87, %88 : vector<8x128xf32>
    %90 = arith.negf %89 : vector<8x128xf32>
    %91 = math.exp %90 : vector<8x128xf32>
    %cst_24 = arith.constant 1.000000e+00 : f32
    %92 = vector.broadcast %cst_24 : f32 to vector<8x128xf32>
    %93 = arith.addf %92, %91 : vector<8x128xf32>
    %94 = arith.divf %92, %93 : vector<8x128xf32>
    %95 = math.tanh %89 : vector<8x128xf32>
    %96 = vector.extract_strided_slice %94 {offsets = [0, 0], sizes = [8, 32], strides = [1, 1]} : vector<8x128xf32> to vector<8x32xf32>
    %97 = vector.extract_strided_slice %94 {offsets = [0, 32], sizes = [8, 32], strides = [1, 1]} : vector<8x128xf32> to vector<8x32xf32>
    %98 = vector.extract_strided_slice %95 {offsets = [0, 64], sizes = [8, 32], strides = [1, 1]} : vector<8x128xf32> to vector<8x32xf32>
    %99 = vector.extract_strided_slice %94 {offsets = [0, 96], sizes = [8, 32], strides = [1, 1]} : vector<8x128xf32> to vector<8x32xf32>
    %100 = arith.mulf %97, %66 : vector<8x32xf32>
    %101 = arith.mulf %96, %98 : vector<8x32xf32>
    %102 = arith.addf %100, %101 : vector<8x32xf32>
    %103 = math.tanh %102 : vector<8x32xf32>
    %104 = arith.mulf %99, %103 : vector<8x32xf32>
    %105 = tpu.concatenate %104, %86 in 1 : vector<8x32xf32>, vector<8x32xf32> -> vector<8x64xf32>
    %cst_25 = arith.constant dense<0.000000e+00> : vector<8x128xf32>
    %106 = tpu.matmul %105, %7, %cst_25 {dimension_numbers = #tpu.dot_dimension_numbers<[1], [0], [0], [1], [0, 0, 1, 1], [], []>} : vector<8x64xf32>, vector<64x128xf32>, vector<8x128xf32> -> vector<8x128xf32>
    %107 = arith.addf %106, %10 : vector<8x128xf32>
    %108 = arith.negf %107 : vector<8x128xf32>
    %109 = math.exp %108 : vector<8x128xf32>
    %cst_26 = arith.constant 1.000000e+00 : f32
    %110 = vector.broadcast %cst_26 : f32 to vector<8x128xf32>
    %111 = arith.addf %110, %109 : vector<8x128xf32>
    %112 = arith.divf %110, %111 : vector<8x128xf32>
    %113 = math.tanh %107 : vector<8x128xf32>
    %114 = vector.extract_strided_slice %112 {offsets = [0, 0], sizes = [8, 32], strides = [1, 1]} : vector<8x128xf32> to vector<8x32xf32>
    %115 = vector.extract_strided_slice %112 {offsets = [0, 32], sizes = [8, 32], strides = [1, 1]} : vector<8x128xf32> to vector<8x32xf32>
    %116 = vector.extract_strided_slice %113 {offsets = [0, 64], sizes = [8, 32], strides = [1, 1]} : vector<8x128xf32> to vector<8x32xf32>
    %117 = vector.extract_strided_slice %112 {offsets = [0, 96], sizes = [8, 32], strides = [1, 1]} : vector<8x128xf32> to vector<8x32xf32>
    %118 = arith.mulf %115, %84 : vector<8x32xf32>
    %119 = arith.mulf %114, %116 : vector<8x32xf32>
    %120 = arith.addf %118, %119 : vector<8x32xf32>
    %121 = math.tanh %120 : vector<8x32xf32>
    %122 = arith.mulf %117, %121 : vector<8x32xf32>
    %123 = vector.extract_strided_slice %5 {offsets = [24, 0], sizes = [8, 128], strides = [1, 1]} : vector<64x128xf32> to vector<8x128xf32>
    %cst_27 = arith.constant dense<0.000000e+00> : vector<8x128xf32>
    %124 = tpu.matmul %104, %6, %cst_27 {dimension_numbers = #tpu.dot_dimension_numbers<[1], [0], [0], [1], [0, 0, 1, 1], [], []>} : vector<8x32xf32>, vector<32x128xf32>, vector<8x128xf32> -> vector<8x128xf32>
    %125 = arith.addf %123, %124 : vector<8x128xf32>
    %126 = arith.negf %125 : vector<8x128xf32>
    %127 = math.exp %126 : vector<8x128xf32>
    %cst_28 = arith.constant 1.000000e+00 : f32
    %128 = vector.broadcast %cst_28 : f32 to vector<8x128xf32>
    %129 = arith.addf %128, %127 : vector<8x128xf32>
    %130 = arith.divf %128, %129 : vector<8x128xf32>
    %131 = math.tanh %125 : vector<8x128xf32>
    %132 = vector.extract_strided_slice %130 {offsets = [0, 0], sizes = [8, 32], strides = [1, 1]} : vector<8x128xf32> to vector<8x32xf32>
    %133 = vector.extract_strided_slice %130 {offsets = [0, 32], sizes = [8, 32], strides = [1, 1]} : vector<8x128xf32> to vector<8x32xf32>
    %134 = vector.extract_strided_slice %131 {offsets = [0, 64], sizes = [8, 32], strides = [1, 1]} : vector<8x128xf32> to vector<8x32xf32>
    %135 = vector.extract_strided_slice %130 {offsets = [0, 96], sizes = [8, 32], strides = [1, 1]} : vector<8x128xf32> to vector<8x32xf32>
    %136 = arith.mulf %133, %102 : vector<8x32xf32>
    %137 = arith.mulf %132, %134 : vector<8x32xf32>
    %138 = arith.addf %136, %137 : vector<8x32xf32>
    %139 = math.tanh %138 : vector<8x32xf32>
    %140 = arith.mulf %135, %139 : vector<8x32xf32>
    %141 = tpu.concatenate %140, %122 in 1 : vector<8x32xf32>, vector<8x32xf32> -> vector<8x64xf32>
    %cst_29 = arith.constant dense<0.000000e+00> : vector<8x128xf32>
    %142 = tpu.matmul %141, %7, %cst_29 {dimension_numbers = #tpu.dot_dimension_numbers<[1], [0], [0], [1], [0, 0, 1, 1], [], []>} : vector<8x64xf32>, vector<64x128xf32>, vector<8x128xf32> -> vector<8x128xf32>
    %143 = arith.addf %142, %10 : vector<8x128xf32>
    %144 = arith.negf %143 : vector<8x128xf32>
    %145 = math.exp %144 : vector<8x128xf32>
    %cst_30 = arith.constant 1.000000e+00 : f32
    %146 = vector.broadcast %cst_30 : f32 to vector<8x128xf32>
    %147 = arith.addf %146, %145 : vector<8x128xf32>
    %148 = arith.divf %146, %147 : vector<8x128xf32>
    %149 = math.tanh %143 : vector<8x128xf32>
    %150 = vector.extract_strided_slice %148 {offsets = [0, 0], sizes = [8, 32], strides = [1, 1]} : vector<8x128xf32> to vector<8x32xf32>
    %151 = vector.extract_strided_slice %148 {offsets = [0, 32], sizes = [8, 32], strides = [1, 1]} : vector<8x128xf32> to vector<8x32xf32>
    %152 = vector.extract_strided_slice %149 {offsets = [0, 64], sizes = [8, 32], strides = [1, 1]} : vector<8x128xf32> to vector<8x32xf32>
    %153 = vector.extract_strided_slice %148 {offsets = [0, 96], sizes = [8, 32], strides = [1, 1]} : vector<8x128xf32> to vector<8x32xf32>
    %154 = arith.mulf %151, %120 : vector<8x32xf32>
    %155 = arith.mulf %150, %152 : vector<8x32xf32>
    %156 = arith.addf %154, %155 : vector<8x32xf32>
    %157 = math.tanh %156 : vector<8x32xf32>
    %158 = arith.mulf %153, %157 : vector<8x32xf32>
    %159 = vector.extract_strided_slice %5 {offsets = [32, 0], sizes = [8, 128], strides = [1, 1]} : vector<64x128xf32> to vector<8x128xf32>
    %cst_31 = arith.constant dense<0.000000e+00> : vector<8x128xf32>
    %160 = tpu.matmul %140, %6, %cst_31 {dimension_numbers = #tpu.dot_dimension_numbers<[1], [0], [0], [1], [0, 0, 1, 1], [], []>} : vector<8x32xf32>, vector<32x128xf32>, vector<8x128xf32> -> vector<8x128xf32>
    %161 = arith.addf %159, %160 : vector<8x128xf32>
    %162 = arith.negf %161 : vector<8x128xf32>
    %163 = math.exp %162 : vector<8x128xf32>
    %cst_32 = arith.constant 1.000000e+00 : f32
    %164 = vector.broadcast %cst_32 : f32 to vector<8x128xf32>
    %165 = arith.addf %164, %163 : vector<8x128xf32>
    %166 = arith.divf %164, %165 : vector<8x128xf32>
    %167 = math.tanh %161 : vector<8x128xf32>
    %168 = vector.extract_strided_slice %166 {offsets = [0, 0], sizes = [8, 32], strides = [1, 1]} : vector<8x128xf32> to vector<8x32xf32>
    %169 = vector.extract_strided_slice %166 {offsets = [0, 32], sizes = [8, 32], strides = [1, 1]} : vector<8x128xf32> to vector<8x32xf32>
    %170 = vector.extract_strided_slice %167 {offsets = [0, 64], sizes = [8, 32], strides = [1, 1]} : vector<8x128xf32> to vector<8x32xf32>
    %171 = vector.extract_strided_slice %166 {offsets = [0, 96], sizes = [8, 32], strides = [1, 1]} : vector<8x128xf32> to vector<8x32xf32>
    %172 = arith.mulf %169, %138 : vector<8x32xf32>
    %173 = arith.mulf %168, %170 : vector<8x32xf32>
    %174 = arith.addf %172, %173 : vector<8x32xf32>
    %175 = math.tanh %174 : vector<8x32xf32>
    %176 = arith.mulf %171, %175 : vector<8x32xf32>
    %177 = tpu.concatenate %176, %158 in 1 : vector<8x32xf32>, vector<8x32xf32> -> vector<8x64xf32>
    %cst_33 = arith.constant dense<0.000000e+00> : vector<8x128xf32>
    %178 = tpu.matmul %177, %7, %cst_33 {dimension_numbers = #tpu.dot_dimension_numbers<[1], [0], [0], [1], [0, 0, 1, 1], [], []>} : vector<8x64xf32>, vector<64x128xf32>, vector<8x128xf32> -> vector<8x128xf32>
    %179 = arith.addf %178, %10 : vector<8x128xf32>
    %180 = arith.negf %179 : vector<8x128xf32>
    %181 = math.exp %180 : vector<8x128xf32>
    %cst_34 = arith.constant 1.000000e+00 : f32
    %182 = vector.broadcast %cst_34 : f32 to vector<8x128xf32>
    %183 = arith.addf %182, %181 : vector<8x128xf32>
    %184 = arith.divf %182, %183 : vector<8x128xf32>
    %185 = math.tanh %179 : vector<8x128xf32>
    %186 = vector.extract_strided_slice %184 {offsets = [0, 0], sizes = [8, 32], strides = [1, 1]} : vector<8x128xf32> to vector<8x32xf32>
    %187 = vector.extract_strided_slice %184 {offsets = [0, 32], sizes = [8, 32], strides = [1, 1]} : vector<8x128xf32> to vector<8x32xf32>
    %188 = vector.extract_strided_slice %185 {offsets = [0, 64], sizes = [8, 32], strides = [1, 1]} : vector<8x128xf32> to vector<8x32xf32>
    %189 = vector.extract_strided_slice %184 {offsets = [0, 96], sizes = [8, 32], strides = [1, 1]} : vector<8x128xf32> to vector<8x32xf32>
    %190 = arith.mulf %187, %156 : vector<8x32xf32>
    %191 = arith.mulf %186, %188 : vector<8x32xf32>
    %192 = arith.addf %190, %191 : vector<8x32xf32>
    %193 = math.tanh %192 : vector<8x32xf32>
    %194 = arith.mulf %189, %193 : vector<8x32xf32>
    %195 = vector.extract_strided_slice %5 {offsets = [40, 0], sizes = [8, 128], strides = [1, 1]} : vector<64x128xf32> to vector<8x128xf32>
    %cst_35 = arith.constant dense<0.000000e+00> : vector<8x128xf32>
    %196 = tpu.matmul %176, %6, %cst_35 {dimension_numbers = #tpu.dot_dimension_numbers<[1], [0], [0], [1], [0, 0, 1, 1], [], []>} : vector<8x32xf32>, vector<32x128xf32>, vector<8x128xf32> -> vector<8x128xf32>
    %197 = arith.addf %195, %196 : vector<8x128xf32>
    %198 = arith.negf %197 : vector<8x128xf32>
    %199 = math.exp %198 : vector<8x128xf32>
    %cst_36 = arith.constant 1.000000e+00 : f32
    %200 = vector.broadcast %cst_36 : f32 to vector<8x128xf32>
    %201 = arith.addf %200, %199 : vector<8x128xf32>
    %202 = arith.divf %200, %201 : vector<8x128xf32>
    %203 = math.tanh %197 : vector<8x128xf32>
    %204 = vector.extract_strided_slice %202 {offsets = [0, 0], sizes = [8, 32], strides = [1, 1]} : vector<8x128xf32> to vector<8x32xf32>
    %205 = vector.extract_strided_slice %202 {offsets = [0, 32], sizes = [8, 32], strides = [1, 1]} : vector<8x128xf32> to vector<8x32xf32>
    %206 = vector.extract_strided_slice %203 {offsets = [0, 64], sizes = [8, 32], strides = [1, 1]} : vector<8x128xf32> to vector<8x32xf32>
    %207 = vector.extract_strided_slice %202 {offsets = [0, 96], sizes = [8, 32], strides = [1, 1]} : vector<8x128xf32> to vector<8x32xf32>
    %208 = arith.mulf %205, %174 : vector<8x32xf32>
    %209 = arith.mulf %204, %206 : vector<8x32xf32>
    %210 = arith.addf %208, %209 : vector<8x32xf32>
    %211 = math.tanh %210 : vector<8x32xf32>
    %212 = arith.mulf %207, %211 : vector<8x32xf32>
    %213 = tpu.concatenate %212, %194 in 1 : vector<8x32xf32>, vector<8x32xf32> -> vector<8x64xf32>
    %cst_37 = arith.constant dense<0.000000e+00> : vector<8x128xf32>
    %214 = tpu.matmul %213, %7, %cst_37 {dimension_numbers = #tpu.dot_dimension_numbers<[1], [0], [0], [1], [0, 0, 1, 1], [], []>} : vector<8x64xf32>, vector<64x128xf32>, vector<8x128xf32> -> vector<8x128xf32>
    %215 = arith.addf %214, %10 : vector<8x128xf32>
    %216 = arith.negf %215 : vector<8x128xf32>
    %217 = math.exp %216 : vector<8x128xf32>
    %cst_38 = arith.constant 1.000000e+00 : f32
    %218 = vector.broadcast %cst_38 : f32 to vector<8x128xf32>
    %219 = arith.addf %218, %217 : vector<8x128xf32>
    %220 = arith.divf %218, %219 : vector<8x128xf32>
    %221 = math.tanh %215 : vector<8x128xf32>
    %222 = vector.extract_strided_slice %220 {offsets = [0, 0], sizes = [8, 32], strides = [1, 1]} : vector<8x128xf32> to vector<8x32xf32>
    %223 = vector.extract_strided_slice %220 {offsets = [0, 32], sizes = [8, 32], strides = [1, 1]} : vector<8x128xf32> to vector<8x32xf32>
    %224 = vector.extract_strided_slice %221 {offsets = [0, 64], sizes = [8, 32], strides = [1, 1]} : vector<8x128xf32> to vector<8x32xf32>
    %225 = vector.extract_strided_slice %220 {offsets = [0, 96], sizes = [8, 32], strides = [1, 1]} : vector<8x128xf32> to vector<8x32xf32>
    %226 = arith.mulf %223, %192 : vector<8x32xf32>
    %227 = arith.mulf %222, %224 : vector<8x32xf32>
    %228 = arith.addf %226, %227 : vector<8x32xf32>
    %229 = math.tanh %228 : vector<8x32xf32>
    %230 = arith.mulf %225, %229 : vector<8x32xf32>
    %231 = vector.extract_strided_slice %5 {offsets = [48, 0], sizes = [8, 128], strides = [1, 1]} : vector<64x128xf32> to vector<8x128xf32>
    %cst_39 = arith.constant dense<0.000000e+00> : vector<8x128xf32>
    %232 = tpu.matmul %212, %6, %cst_39 {dimension_numbers = #tpu.dot_dimension_numbers<[1], [0], [0], [1], [0, 0, 1, 1], [], []>} : vector<8x32xf32>, vector<32x128xf32>, vector<8x128xf32> -> vector<8x128xf32>
    %233 = arith.addf %231, %232 : vector<8x128xf32>
    %234 = arith.negf %233 : vector<8x128xf32>
    %235 = math.exp %234 : vector<8x128xf32>
    %cst_40 = arith.constant 1.000000e+00 : f32
    %236 = vector.broadcast %cst_40 : f32 to vector<8x128xf32>
    %237 = arith.addf %236, %235 : vector<8x128xf32>
    %238 = arith.divf %236, %237 : vector<8x128xf32>
    %239 = math.tanh %233 : vector<8x128xf32>
    %240 = vector.extract_strided_slice %238 {offsets = [0, 0], sizes = [8, 32], strides = [1, 1]} : vector<8x128xf32> to vector<8x32xf32>
    %241 = vector.extract_strided_slice %238 {offsets = [0, 32], sizes = [8, 32], strides = [1, 1]} : vector<8x128xf32> to vector<8x32xf32>
    %242 = vector.extract_strided_slice %239 {offsets = [0, 64], sizes = [8, 32], strides = [1, 1]} : vector<8x128xf32> to vector<8x32xf32>
    %243 = vector.extract_strided_slice %238 {offsets = [0, 96], sizes = [8, 32], strides = [1, 1]} : vector<8x128xf32> to vector<8x32xf32>
    %244 = arith.mulf %241, %210 : vector<8x32xf32>
    %245 = arith.mulf %240, %242 : vector<8x32xf32>
    %246 = arith.addf %244, %245 : vector<8x32xf32>
    %247 = math.tanh %246 : vector<8x32xf32>
    %248 = arith.mulf %243, %247 : vector<8x32xf32>
    %249 = tpu.concatenate %248, %230 in 1 : vector<8x32xf32>, vector<8x32xf32> -> vector<8x64xf32>
    %cst_41 = arith.constant dense<0.000000e+00> : vector<8x128xf32>
    %250 = tpu.matmul %249, %7, %cst_41 {dimension_numbers = #tpu.dot_dimension_numbers<[1], [0], [0], [1], [0, 0, 1, 1], [], []>} : vector<8x64xf32>, vector<64x128xf32>, vector<8x128xf32> -> vector<8x128xf32>
    %251 = arith.addf %250, %10 : vector<8x128xf32>
    %252 = arith.negf %251 : vector<8x128xf32>
    %253 = math.exp %252 : vector<8x128xf32>
    %cst_42 = arith.constant 1.000000e+00 : f32
    %254 = vector.broadcast %cst_42 : f32 to vector<8x128xf32>
    %255 = arith.addf %254, %253 : vector<8x128xf32>
    %256 = arith.divf %254, %255 : vector<8x128xf32>
    %257 = math.tanh %251 : vector<8x128xf32>
    %258 = vector.extract_strided_slice %256 {offsets = [0, 0], sizes = [8, 32], strides = [1, 1]} : vector<8x128xf32> to vector<8x32xf32>
    %259 = vector.extract_strided_slice %256 {offsets = [0, 32], sizes = [8, 32], strides = [1, 1]} : vector<8x128xf32> to vector<8x32xf32>
    %260 = vector.extract_strided_slice %257 {offsets = [0, 64], sizes = [8, 32], strides = [1, 1]} : vector<8x128xf32> to vector<8x32xf32>
    %261 = vector.extract_strided_slice %256 {offsets = [0, 96], sizes = [8, 32], strides = [1, 1]} : vector<8x128xf32> to vector<8x32xf32>
    %262 = arith.mulf %259, %228 : vector<8x32xf32>
    %263 = arith.mulf %258, %260 : vector<8x32xf32>
    %264 = arith.addf %262, %263 : vector<8x32xf32>
    %265 = math.tanh %264 : vector<8x32xf32>
    %266 = arith.mulf %261, %265 : vector<8x32xf32>
    %267 = vector.extract_strided_slice %5 {offsets = [56, 0], sizes = [8, 128], strides = [1, 1]} : vector<64x128xf32> to vector<8x128xf32>
    %cst_43 = arith.constant dense<0.000000e+00> : vector<8x128xf32>
    %268 = tpu.matmul %248, %6, %cst_43 {dimension_numbers = #tpu.dot_dimension_numbers<[1], [0], [0], [1], [0, 0, 1, 1], [], []>} : vector<8x32xf32>, vector<32x128xf32>, vector<8x128xf32> -> vector<8x128xf32>
    %269 = arith.addf %267, %268 : vector<8x128xf32>
    %270 = arith.negf %269 : vector<8x128xf32>
    %271 = math.exp %270 : vector<8x128xf32>
    %cst_44 = arith.constant 1.000000e+00 : f32
    %272 = vector.broadcast %cst_44 : f32 to vector<8x128xf32>
    %273 = arith.addf %272, %271 : vector<8x128xf32>
    %274 = arith.divf %272, %273 : vector<8x128xf32>
    %275 = math.tanh %269 : vector<8x128xf32>
    %276 = vector.extract_strided_slice %274 {offsets = [0, 0], sizes = [8, 32], strides = [1, 1]} : vector<8x128xf32> to vector<8x32xf32>
    %277 = vector.extract_strided_slice %274 {offsets = [0, 32], sizes = [8, 32], strides = [1, 1]} : vector<8x128xf32> to vector<8x32xf32>
    %278 = vector.extract_strided_slice %275 {offsets = [0, 64], sizes = [8, 32], strides = [1, 1]} : vector<8x128xf32> to vector<8x32xf32>
    %279 = vector.extract_strided_slice %274 {offsets = [0, 96], sizes = [8, 32], strides = [1, 1]} : vector<8x128xf32> to vector<8x32xf32>
    %280 = arith.mulf %277, %246 : vector<8x32xf32>
    %281 = arith.mulf %276, %278 : vector<8x32xf32>
    %282 = arith.addf %280, %281 : vector<8x32xf32>
    %283 = math.tanh %282 : vector<8x32xf32>
    %284 = arith.mulf %279, %283 : vector<8x32xf32>
    %285 = tpu.concatenate %284, %266 in 1 : vector<8x32xf32>, vector<8x32xf32> -> vector<8x64xf32>
    %cst_45 = arith.constant dense<0.000000e+00> : vector<8x128xf32>
    %286 = tpu.matmul %285, %7, %cst_45 {dimension_numbers = #tpu.dot_dimension_numbers<[1], [0], [0], [1], [0, 0, 1, 1], [], []>} : vector<8x64xf32>, vector<64x128xf32>, vector<8x128xf32> -> vector<8x128xf32>
    %287 = arith.addf %286, %10 : vector<8x128xf32>
    %288 = arith.negf %287 : vector<8x128xf32>
    %289 = math.exp %288 : vector<8x128xf32>
    %cst_46 = arith.constant 1.000000e+00 : f32
    %290 = vector.broadcast %cst_46 : f32 to vector<8x128xf32>
    %291 = arith.addf %290, %289 : vector<8x128xf32>
    %292 = arith.divf %290, %291 : vector<8x128xf32>
    %293 = math.tanh %287 : vector<8x128xf32>
    %294 = vector.extract_strided_slice %292 {offsets = [0, 0], sizes = [8, 32], strides = [1, 1]} : vector<8x128xf32> to vector<8x32xf32>
    %295 = vector.extract_strided_slice %292 {offsets = [0, 32], sizes = [8, 32], strides = [1, 1]} : vector<8x128xf32> to vector<8x32xf32>
    %296 = vector.extract_strided_slice %293 {offsets = [0, 64], sizes = [8, 32], strides = [1, 1]} : vector<8x128xf32> to vector<8x32xf32>
    %297 = vector.extract_strided_slice %292 {offsets = [0, 96], sizes = [8, 32], strides = [1, 1]} : vector<8x128xf32> to vector<8x32xf32>
    %298 = arith.mulf %295, %264 : vector<8x32xf32>
    %299 = arith.mulf %294, %296 : vector<8x32xf32>
    %300 = arith.addf %298, %299 : vector<8x32xf32>
    %301 = math.tanh %300 : vector<8x32xf32>
    %302 = arith.mulf %297, %301 : vector<8x32xf32>
    %303 = tpu.concatenate %50, %86, %122, %158, %194, %230, %266, %302 in 0 : vector<8x32xf32>, vector<8x32xf32>, vector<8x32xf32>, vector<8x32xf32>, vector<8x32xf32>, vector<8x32xf32>, vector<8x32xf32>, vector<8x32xf32> -> vector<64x32xf32>
    %c0_47 = arith.constant 0 : index
    %c0_48 = arith.constant 0 : index
    %304 = vector.load %arg6[%c0_47, %c0_48] : memref<32x1xf32, #tpu.memory_space<vmem>>, vector<32x1xf32>
    %cst_49 = arith.constant dense<0.000000e+00> : vector<64x1xf32>
    %305 = tpu.matmul %303, %304, %cst_49 {dimension_numbers = #tpu.dot_dimension_numbers<[1], [0], [0], [1], [0, 0, 1, 1], [], []>} : vector<64x32xf32>, vector<32x1xf32>, vector<64x1xf32> -> vector<64x1xf32>
    %c0_50 = arith.constant 0 : index
    %c0_51 = arith.constant 0 : index
    %306 = vector.load %arg7[%c0_50, %c0_51] : memref<1x1xf32, #tpu.memory_space<vmem>>, vector<1x1xf32>
    %307 = vector.broadcast %306 : vector<1x1xf32> to vector<64x1xf32>
    %308 = arith.addf %305, %307 : vector<64x1xf32>
    %c0_52 = arith.constant 0 : index
    %c0_53 = arith.constant 0 : index
    %309 = vector.load %arg8[%c0_52, %c0_53] : memref<64x1xf32, #tpu.memory_space<vmem>>, vector<64x1xf32>
    tpu.vector_store %arg8[%c0_52, %c0_53], %308 {strides = array<i32>} : memref<64x1xf32, #tpu.memory_space<vmem>>, vector<64x1xf32>,
    return
  }
}

</mosaic_0001>

<bundles_post_ra>
// kernel: lstm_module_forward.1
= control target key start
LH: loop header
LB: loop body
LE: loop exit
PB: predicated region body
PF: predicated region fallthrough
CT: control target
= control target key end

     0   :  { %vm72_vm0 = vcmask 1043456   ;;  %vm47_vm1 = vcmask 31744   ;;  %v2589_v0 = vmov 0.0   ;;  %vm2590_vm2 = vmmov 0   ;;  %s2591_s20 = smov 64   ;;  %s2592_s21 = smov 32   ;;  %s3258_s1 = inlined_call_operand.vmem [shape: f32[4,128], index: 1, kind: input, shape index: {}]   ;;  %s3259_s2 = inlined_call_operand.vmem [shape: f32[32,128], index: 2, kind: input, shape index: {}]   ;;  %s3260_s0 = inlined_call_operand.vmem [shape: f32[64,4], index: 0, kind: input, shape index: {}]   ;;  %s3261_s3 = inlined_call_operand.vmem [shape: f32[1,128], index: 3, kind: input, shape index: {}]   ;;  %s3262_s4 = inlined_call_operand.vmem [shape: f32[64,128], index: 4, kind: input, shape index: {}]   ;;  %s3263_s5 = inlined_call_operand.vmem [shape: f32[1,128], index: 5, kind: input, shape index: {}]   ;;  %s3264_s6 = inlined_call_operand.vmem [shape: f32[32,1], index: 6, kind: input, shape index: {}]   ;;  %s3265_s7 = inlined_call_operand.<no memory space> [shape: f32[1,1], index: 7, kind: input, shape index: {}]   ;;  %s3266_s8 = inlined_call_operand.vmem [shape: f32[64,1], index: 8, kind: output, shape index: {}]  }
   0x1   :  { %2183 = vmatprep.subr.mxu1 %v2589_v0  ;;  %v39_v1 = vld [vmem:[%s3258_s1] sm:$0xf]  ;;  %v2645_v2 = vld [vmem:[%s3259_s2 + $0x18] sm:$0xff]  ;;  %2191 = vmatprep.mubr.msk.f32.mxu1 %vm2590_vm2, %v2589_v0  ;;  %v32_v4 = vld [vmem:[%s3260_s0 + $0x8] sm:$0xff]  ;;  %vm200_vm3 = vcmask 261120   ;;  %vm304_vm4 = vcmask 523264  }
   0x2   :  { %v31_v3 = vld [vmem:[%s3260_s0] sm:$0xff]  ;;  %2169 = vmatprep.subr.msk.mxu0 %vm72_vm0, %v39_v1  ;;  %2184 = vmatpush3.msra.mxu1 %v2645_v2  ;;  %v2659_v5 = vld [vmem:[%s3259_s2 + $0x10] sm:$0xff]  ;;  %v2667_v6 = vld [vmem:[%s3259_s2 + $0x8] sm:$0xff]  ;;  %vm1972_vm5 = vcmask 7168  }
   0x3   :  { %2170 = vmatpush3.msk.msra.mxu0 %vm72_vm0, %v39_v1  ;;  %2171 = vmatprep.mubr.msk.f32.mxu0 %vm47_vm1, %v31_v3  ;;  %v2675_v7 = vld [vmem:[%s3259_s2] sm:$0xff]  ;;  %v33_v25 = vld [vmem:[%s3260_s0 + $0x10] sm:$0xff]  ;;  %v34_v26 = vld [vmem:[%s3260_s0 + $0x18] sm:$0xff] }
   0x4   :  { %2185 = vmatprep.subr.mxu1 %v2589_v0  ;;  %2172 = vmatmul.mubr.msk.f32.vlgmr.msra.gmra.mxu0 %vm47_vm1, %v32_v4  ;;  %v2697_v9 = vld [vmem:[%s3261_s3] ss:$0 sm:$0xff]  ;;  %v2714_v27 = vld [vmem:[%s3262_s4 + $0x38] sm:$0xff]  ;;  %v2720_v28 = vld [vmem:[%s3262_s4 + $0x30] sm:$0xff] }
   0x5   :  { %2186 = vmatpush3.msra.mxu1 %v2659_v5  ;;  %2194 = vmatprep.subr.mxu0 %v2589_v0  ;;  %v35_v29 = vld [vmem:[%s3260_s0 + $0x20] sm:$0xff]  ;;  %v2731_v30 = vld [vmem:[%s3262_s4 + $0x28] sm:$0xff]  ;;  %v37_v33 = vld [vmem:[%s3260_s0 + $0x30] sm:$0xff] }
   0x6   :  { %2187 = vmatprep.subr.mxu1 %v2589_v0  ;;  %2174 = vmatprep.mubr.msk.f32.mxu0 %vm47_vm1, %v33_v25  ;;  %v36_v31 = vld [vmem:[%s3260_s0 + $0x28] sm:$0xff]  ;;  %v2742_v32 = vld [vmem:[%s3262_s4 + $0x20] sm:$0xff]  ;;  %v2753_v34 = vld [vmem:[%s3262_s4 + $0x18] sm:$0xff] }
   0x7   :  { %2188 = vmatpush3.msra.mxu1 %v2667_v6  ;;  %2195 = vmatpush3.msra.mxu0 %v2714_v27  ;;  %v38_v35 = vld [vmem:[%s3260_s0 + $0x38] sm:$0xff]  ;;  %v2765_v37 = vld [vmem:[%s3262_s4 + $0x10] sm:$0xff]  ;;  %v2773_v38 = vld [vmem:[%s3262_s4 + $0x8] sm:$0xff] }
   0x8   :  { %2189 = vmatprep.subr.mxu1 %v2589_v0  ;;  %2196 = vmatprep.subr.mxu0 %v2589_v0  ;;  %v2782_v39 = vld [vmem:[%s3262_s4] sm:$0xff] }
   0x9   :  { %2190 = vmatpush3.msra.mxu1 %v2675_v7  ;;  %2175 = vmatmul.mubr.msk.f32.gmra.mxu0 %vm47_vm1, %v34_v26  ;;  %v2837_v51 = vld [vmem:[%s3263_s5] ss:$0 sm:$0xff] }
   0xa   :  { %2192 = vmatmul.mubr.f32.vlgmr.msra.gmra.mxu1 %v2589_v0  ;;  %2213 = vmatprep.subr.mxu1 %v2589_v0 }
   0xb   :  { %2214 = vmatpush3.msra.mxu1 %v2645_v2  ;;  %2221 = vmatprep.mubr.msk.f32.mxu1 %vm2590_vm2, %v2589_v0 }
   0xc   :  { %2215 = vmatprep.subr.mxu1 %v2589_v0  ;;  %2197 = vmatpush3.msra.mxu0 %v2720_v28 }
   0xd   :  { %2216 = vmatpush3.msra.mxu1 %v2659_v5  ;;  %2177 = vmatprep.mubr.msk.f32.mxu0 %vm47_vm1, %v35_v29 }
   0xe   :  { %2217 = vmatprep.subr.mxu1 %v2589_v0  ;;  %2198 = vmatprep.subr.mxu0 %v2589_v0 }
   0xf   :  { %2218 = vmatpush3.msra.mxu1 %v2667_v6  ;;  %2199 = vmatpush3.msra.mxu0 %v2731_v30 }
  0x10   :  { %2219 = vmatprep.subr.mxu1 %v2589_v0  ;;  %2200 = vmatprep.subr.mxu0 %v2589_v0 }
  0x11   :  { %2220 = vmatpush3.msra.mxu1 %v2675_v7  ;;  %2178 = vmatmul.mubr.msk.f32.gmra.mxu0 %vm47_vm1, %v36_v31 }
  0x12   :  { %2224 = vmatprep.subr.mxu1 %v2589_v0  ;;  %2201 = vmatpush3.msra.mxu0 %v2742_v32 }
  0x13   :  { %2180 = vmatprep.mubr.msk.f32.mxu0 %vm47_vm1, %v37_v33  ;;  %2202 = vmatprep.subr.mxu0 %v2589_v0 }
  0x14   :  { %2203 = vmatpush3.msra.mxu0 %v2753_v34 }
  0x15   :  { %2204 = vmatprep.subr.mxu0 %v2589_v0  ;;  %2181 = vmatmul.mubr.msk.f32.gmra.mxu0 %vm47_vm1, %v38_v35 }
  0x16   :  { %2205 = vmatpush3.msra.mxu0 %v2765_v37  ;;  %2210 = vmatprep.mubr.msk.f32.mxu0 %vm2590_vm2, %v2589_v0 }
  0x17   :  { %2206 = vmatprep.subr.mxu0 %v2589_v0 }
  0x18   :  { %2207 = vmatpush3.msra.mxu0 %v2773_v38 }
  0x19   :  { %2208 = vmatprep.subr.mxu0 %v2589_v0 }
  0x1a   :  { %2209 = vmatpush3.msra.mxu0 %v2782_v39 }
  0x1b   :  { %2243 = vmatprep.subr.mxu0 %v2589_v0 }
  0xc4   :  { %v2692_v8 = vpop.f32.mrf.mxu0 }
  0xc5   :  { %v148_v49 = vadd.f32 %v2692_v8, %v2697_v9 }
  0xc6   :  { %v142_v10 = vpop.f32.mrf.mxu0 }
  0xc7   :  { %v143_v11 = vadd.f32 %v2697_v9, %v142_v10 }
  0xc9   :  { %v2820_v44 = vpop.f32.mrf.mxu0 }
  0xca   :  { %v270_v12 = vpop.f32.mrf.mxu1 }
  0xcb   :  { %v274_v13 = vadd.f32 %v270_v12, %v143_v11  ;;  %v2822_v45 = vpop.f32.mrf.mxu0 }
  0xcc   :  { %v2193_v14 = vpop.f32.mrf.mxu1  ;;  %v153_v33 = vadd.f32 %v2697_v9, %v2822_v45 }
  0xcd   :  { %2447 = vtanh.f32 %v274_v13  ;;  %v1996_v16 = vmul.f32 -1.442695, %v274_v13 }
  0xcf   :  { %2449 = vpow2.f32 %v1996_v16 }
  0xd1   :  { %v2824_v46 = vpop.f32.mrf.mxu0 }
  0xd3   :  { %v2826_v47 = vpop.f32.mrf.mxu0 }
  0xd5   :  { %v2828_v48 = vpop.f32.mrf.mxu0 }
  0xd7   :  { %v2832_v50 = vpop.f32.mrf.mxu0 }
  0xda   :  { %v2448_v15 = vpop.eup %2447 }
  0xdb   :  { %284 = vrot.lane.b32.xlu0 %v2448_v15, %s2591_s20 }
  0xdc   :  { %v2450_v17 = vpop.eup %2449 }
  0xdd   :  { %v278_v18 = vadd.f32 1.0, %v2450_v17 }
  0xdf   :  { %2451 = vrcp.f32 %v278_v18 }
  0xec   :  { %v2452_v19 = vpop.eup %2451 }
  0xed   :  { %v282_v22 = vmul.f32 0.0, %v2452_v19 }
 0x14d   :  { %v285_v20 = vpop.permute.xlu0 %284 }
 0x14e   :  { %v287_v21 = vmul.f32 %v2452_v19, %v285_v20 }
 0x150   :  { %289 = vrot.lane.b32.xlu0 %v287_v21, %s2592_s21 }
 0x1c2   :  { %v290_v23 = vpop.permute.xlu0 %289 }
 0x1c3   :  { %v2702_v24 = vadd.f32 %v290_v23, %v282_v22 }
 0x1c5   :  { %2453 = vtanh.f32 %v2702_v24 }
 0x1d2   :  { %v2454_v36 = vpop.eup %2453 }
 0x1d3   :  { %295 = vrot.lane.b32.xlu1 %v2454_v36, %s2591_s20 }
 0x245   :  { %v296_v40 = vpop.permute.xlu1 %295 }
 0x246   :  { %v298_v41 = vmul.f32 %v2452_v19, %v296_v40 }
 0x248   :  { %300 = vrot.lane.b32.xlu1 %v298_v41, %s2592_s21 }
 0x2ba   :  { %v301_v42 = vpop.permute.xlu1 %300 }
 0x2bb   :  { %v303_v43 = vsel %vm200_vm3, %v301_v42, 0.0  ;;  %2222 = vmatmul.mubr.msk.f32.vlgmr.msra.gmra.mxu1 %vm200_vm3, %v301_v42 }
 0x2bc   :  { %2211 = vmatmul.mubr.msk.f32.vlgmr.msra.gmra.mxu0 %vm304_vm4, %v303_v43  ;;  %2225 = vmatpush3.msra.mxu1 %v2714_v27 }
 0x2bd   :  { %2226 = vmatprep.subr.mxu1 %v2589_v0  ;;  %2244 = vmatpush3.msra.mxu0 %v2645_v2 }
 0x2be   :  { %2227 = vmatpush3.msra.mxu1 %v2720_v28  ;;  %2245 = vmatprep.subr.mxu0 %v2589_v0 }
 0x2bf   :  { %2228 = vmatprep.subr.mxu1 %v2589_v0  ;;  %2246 = vmatpush3.msra.mxu0 %v2659_v5 }
 0x2c0   :  { %2229 = vmatpush3.msra.mxu1 %v2731_v30  ;;  %2247 = vmatprep.subr.mxu0 %v2589_v0 }
 0x2c1   :  { %2230 = vmatprep.subr.mxu1 %v2589_v0  ;;  %2248 = vmatpush3.msra.mxu0 %v2667_v6 }
 0x2c2   :  { %2231 = vmatpush3.msra.mxu1 %v2742_v32  ;;  %2249 = vmatprep.subr.mxu0 %v2589_v0 }
 0x2c3   :  { %2232 = vmatprep.subr.mxu1 %v2589_v0  ;;  %2250 = vmatpush3.msra.mxu0 %v2675_v7 }
 0x2c4   :  { %2233 = vmatpush3.msra.mxu1 %v2753_v34  ;;  %2251 = vmatprep.mubr.msk.f32.mxu0 %vm2590_vm2, %v2589_v0 }
 0x2c5   :  { %2234 = vmatprep.subr.mxu1 %v2589_v0  ;;  %2240 = vmatprep.mubr.msk.f32.mxu1 %vm2590_vm2, %v2589_v0 }
 0x2c6   :  { %2235 = vmatpush3.msra.mxu1 %v2765_v37  ;;  %2254 = vmatprep.subr.mxu0 %v2589_v0 }
 0x2c7   :  { %2236 = vmatprep.subr.mxu1 %v2589_v0 }
 0x2c8   :  { %2237 = vmatpush3.msra.mxu1 %v2773_v38 }
 0x2c9   :  { %2238 = vmatprep.subr.mxu1 %v2589_v0 }
 0x2ca   :  { %2239 = vmatpush3.msra.mxu1 %v2782_v39 }
 0x2cb   :  { %2273 = vmatprep.subr.mxu1 %v2589_v0 }
 0x37b   :  { %v470_v52 = vpop.f32.mrf.mxu1 }
 0x37c   :  { %v474_v53 = vadd.f32 %v470_v52, %v148_v49  ;;  %v374_v54 = vpop.f32.mrf.mxu0 }
 0x37d   :  { %v375_v55 = vadd.f32 %v2837_v51, %v374_v54  ;;  %v2223_v56 = vpop.f32.mrf.mxu1 }
 0x37e   :  { %2455 = vtanh.f32 %v474_v53  ;;  %v2212_v57 = vpop.f32.mrf.mxu0  ;;  %v2000_v60 = vmul.f32 -1.442695, %v474_v53 }
 0x37f   :  { %2457 = vtanh.f32 %v375_v55  ;;  %v1998_v61 = vmul.f32 -1.442695, %v375_v55 }
 0x380   :  { %2459 = vpow2.f32 %v2000_v60 }
 0x381   :  { %2461 = vpow2.f32 %v1998_v61 }
 0x38b   :  { %v2456_v58 = vpop.eup %2455 }
 0x38c   :  { %v2458_v59 = vpop.eup %2457  ;;  %484 = vrot.lane.b32.xlu1 %v2456_v58, %s2591_s20 }
 0x38d   :  { %387 = vrot.lane.b32.xlu0 %v2458_v59, %s2591_s20  ;;  %v2460_v62 = vpop.eup %2459 }
 0x38e   :  { %v2462_v63 = vpop.eup %2461  ;;  %v478_v1 = vadd.f32 1.0, %v2460_v62 }
 0x38f   :  { %v381_v3 = vadd.f32 1.0, %v2462_v63 }
 0x390   :  { %2463 = vrcp.f32 %v478_v1 }
 0x391   :  { %2465 = vrcp.f32 %v381_v3 }
 0x39d   :  { %v2464_v4 = vpop.eup %2463 }
 0x39e   :  { %v2466_v10 = vpop.eup %2465  ;;  %v482_v14 = vmul.f32 %v2464_v4, %v2702_v24 }
 0x39f   :  { %v385_v16 = vmul.f32 0.0, %v2466_v10 }
 0x3fe   :  { %v485_v8 = vpop.permute.xlu1 %484 }
 0x3ff   :  { %v487_v11 = vmul.f32 %v2464_v4, %v485_v8  ;;  %v388_v12 = vpop.permute.xlu0 %387 }
 0x400   :  { %v390_v13 = vmul.f32 %v2466_v10, %v388_v12 }
 0x401   :  { %489 = vrot.lane.b32.xlu1 %v487_v11, %s2592_s21 }
 0x402   :  { %392 = vrot.lane.b32.xlu0 %v390_v13, %s2592_s21 }
 0x473   :  { %v490_v15 = vpop.permute.xlu1 %489 }
 0x474   :  { %v2845_v17 = vadd.f32 %v490_v15, %v482_v14  ;;  %v393_v18 = vpop.permute.xlu0 %392 }
 0x475   :  { %v2847_v19 = vadd.f32 %v393_v18, %v385_v16 }
 0x476   :  { %2467 = vtanh.f32 %v2845_v17 }
 0x477   :  { %2469 = vtanh.f32 %v2847_v19 }
 0x483   :  { %v2468_v20 = vpop.eup %2467 }
 0x484   :  { %v2470_v21 = vpop.eup %2469  ;;  %495 = vrot.lane.b32.xlu1 %v2468_v20, %s2591_s20 }
 0x485   :  { %398 = vrot.lane.b32.xlu0 %v2470_v21, %s2591_s20  ;;  %v158_v21 = vadd.f32 %v2820_v44, %v2697_v9 }
 0x4f6   :  { %v496_v22 = vpop.permute.xlu1 %495 }
 0x4f7   :  { %v498_v23 = vmul.f32 %v2464_v4, %v496_v22  ;;  %v399_v24 = vpop.permute.xlu0 %398 }
 0x4f8   :  { %v2853_v25 = vmul.f32 %v2466_v10, %v399_v24 }
 0x4f9   :  { %500 = vrot.lane.b32.xlu0 %v498_v23, %s2592_s21 }
 0x4fa   :  { %504 = vrot.lane.b32.xlu1 %v2853_v25, %s2591_s20 }
 0x56b   :  { %v501_v26 = vpop.permute.xlu0 %500 }
 0x56c   :  { %v505_v29 = vpop.permute.xlu1 %504  ;;  %2252 = vmatmul.mubr.msk.f32.vlgmr.msra.gmra.mxu0 %vm200_vm3, %v501_v26 }
 0x56d   :  { %v507_v31 = vsel %vm200_vm3, %v501_v26, %v505_v29  ;;  %2255 = vmatpush3.msra.mxu0 %v2714_v27  ;;  %2270 = vmatprep.mubr.msk.f32.mxu0 %vm2590_vm2, %v2589_v0 }
 0x56e   :  { %2241 = vmatmul.mubr.msk.f32.vlgmr.msra.gmra.mxu1 %vm304_vm4, %v507_v31  ;;  %2256 = vmatprep.subr.mxu0 %v2589_v0 }
 0x56f   :  { %2257 = vmatpush3.msra.mxu0 %v2720_v28  ;;  %2274 = vmatpush3.msra.mxu1 %v2645_v2 }
 0x570   :  { %2258 = vmatprep.subr.mxu0 %v2589_v0  ;;  %2275 = vmatprep.subr.mxu1 %v2589_v0 }
 0x571   :  { %2259 = vmatpush3.msra.mxu0 %v2731_v30  ;;  %2276 = vmatpush3.msra.mxu1 %v2659_v5 }
 0x572   :  { %2260 = vmatprep.subr.mxu0 %v2589_v0  ;;  %2277 = vmatprep.subr.mxu1 %v2589_v0 }
 0x573   :  { %2261 = vmatpush3.msra.mxu0 %v2742_v32  ;;  %2278 = vmatpush3.msra.mxu1 %v2667_v6 }
 0x574   :  { %2262 = vmatprep.subr.mxu0 %v2589_v0  ;;  %2279 = vmatprep.subr.mxu1 %v2589_v0 }
 0x575   :  { %2263 = vmatpush3.msra.mxu0 %v2753_v34  ;;  %2280 = vmatpush3.msra.mxu1 %v2675_v7 }
 0x576   :  { %2264 = vmatprep.subr.mxu0 %v2589_v0  ;;  %2281 = vmatprep.mubr.msk.f32.mxu1 %vm2590_vm2, %v2589_v0 }
 0x577   :  { %2265 = vmatpush3.msra.mxu0 %v2765_v37  ;;  %2284 = vmatprep.subr.mxu1 %v2589_v0 }
 0x578   :  { %2266 = vmatprep.subr.mxu0 %v2589_v0 }
 0x579   :  { %2267 = vmatpush3.msra.mxu0 %v2773_v38 }
 0x57a   :  { %2268 = vmatprep.subr.mxu0 %v2589_v0 }
 0x57b   :  { %2269 = vmatpush3.msra.mxu0 %v2782_v39 }
 0x57c   :  { %2303 = vmatprep.subr.mxu0 %v2589_v0 }
 0x62c   :  { %v673_v35 = vpop.f32.mrf.mxu0 }
 0x62d   :  { %v677_v36 = vadd.f32 %v673_v35, %v153_v33 }
 0x62e   :  { %v577_v40 = vpop.f32.mrf.mxu1  ;;  %v2253_v41 = vpop.f32.mrf.mxu0 }
 0x62f   :  { %2471 = vtanh.f32 %v677_v36  ;;  %v578_v42 = vadd.f32 %v2837_v51, %v577_v40  ;;  %v2004_v53 = vmul.f32 -1.442695, %v677_v36 }
 0x630   :  { %v2242_v43 = vpop.f32.mrf.mxu1 }
 0x631   :  { %2473 = vtanh.f32 %v578_v42  ;;  %v2002_v54 = vmul.f32 -1.442695, %v578_v42 }
 0x632   :  { %2475 = vpow2.f32 %v2004_v53 }
 0x633   :  { %2477 = vpow2.f32 %v2002_v54 }
 0x63c   :  { %v2472_v49 = vpop.eup %2471 }
 0x63d   :  { %687 = vrot.lane.b32.xlu1 %v2472_v49, %s2591_s20 }
 0x63e   :  { %v2474_v52 = vpop.eup %2473 }
 0x63f   :  { %590 = vrot.lane.b32.xlu0 %v2474_v52, %s2591_s20  ;;  %v2476_v45 = vpop.eup %2475 }
 0x640   :  { %v2478_v55 = vpop.eup %2477  ;;  %v681_v56 = vadd.f32 1.0, %v2476_v45 }
 0x641   :  { %v584_v57 = vadd.f32 1.0, %v2478_v55 }
 0x642   :  { %2479 = vrcp.f32 %v681_v56 }
 0x643   :  { %2481 = vrcp.f32 %v584_v57 }
 0x64f   :  { %v2480_v58 = vpop.eup %2479 }
 0x650   :  { %v2482_v61 = vpop.eup %2481  ;;  %v685_v1 = vmul.f32 %v2480_v58, %v2845_v17 }
 0x651   :  { %v588_v8 = vmul.f32 %v2482_v61, %v2847_v19 }
 0x6af   :  { %v688_v59 = vpop.permute.xlu1 %687 }
 0x6b0   :  { %v690_v60 = vmul.f32 %v2480_v58, %v688_v59 }
 0x6b1   :  { %v591_v62 = vpop.permute.xlu0 %590 }
 0x6b2   :  { %692 = vrot.lane.b32.xlu1 %v690_v60, %s2592_s21  ;;  %v593_v63 = vmul.f32 %v2482_v61, %v591_v62 }
 0x6b4   :  { %595 = vrot.lane.b32.xlu0 %v593_v63, %s2592_s21 }
 0x724   :  { %v693_v3 = vpop.permute.xlu1 %692 }
 0x725   :  { %v2897_v4 = vadd.f32 %v693_v3, %v685_v1 }
 0x726   :  { %v596_v10 = vpop.permute.xlu0 %595 }
 0x727   :  { %2483 = vtanh.f32 %v2897_v4  ;;  %v2901_v11 = vadd.f32 %v596_v10, %v588_v8 }
 0x729   :  { %2485 = vtanh.f32 %v2901_v11 }
 0x734   :  { %v2484_v12 = vpop.eup %2483 }
 0x735   :  { %698 = vrot.lane.b32.xlu1 %v2484_v12, %s2591_s20 }
 0x736   :  { %v2486_v13 = vpop.eup %2485 }
 0x737   :  { %601 = vrot.lane.b32.xlu0 %v2486_v13, %s2591_s20  ;;  %v163_v13 = vadd.f32 %v2697_v9, %v2826_v47 }
 0x7a7   :  { %v699_v14 = vpop.permute.xlu1 %698 }
 0x7a8   :  { %v701_v15 = vmul.f32 %v2480_v58, %v699_v14 }
 0x7a9   :  { %v602_v16 = vpop.permute.xlu0 %601 }
 0x7aa   :  { %703 = vrot.lane.b32.xlu0 %v701_v15, %s2592_s21  ;;  %v2907_v17 = vmul.f32 %v2482_v61, %v602_v16 }
 0x7ac   :  { %707 = vrot.lane.b32.xlu1 %v2907_v17, %s2591_s20 }
 0x81c   :  { %v704_v18 = vpop.permute.xlu0 %703 }
 0x81d   :  { %2282 = vmatmul.mubr.msk.f32.vlgmr.msra.gmra.mxu1 %vm200_vm3, %v704_v18 }
 0x81e   :  { %2285 = vmatpush3.msra.mxu1 %v2714_v27  ;;  %2300 = vmatprep.mubr.msk.f32.mxu1 %vm2590_vm2, %v2589_v0  ;;  %v708_v19 = vpop.permute.xlu1 %707 }
 0x81f   :  { %2286 = vmatprep.subr.mxu1 %v2589_v0  ;;  %v710_v20 = vsel %vm200_vm3, %v704_v18, %v708_v19 }
 0x820   :  { %2287 = vmatpush3.msra.mxu1 %v2720_v28  ;;  %2271 = vmatmul.mubr.msk.f32.vlgmr.msra.gmra.mxu0 %vm304_vm4, %v710_v20 }
 0x821   :  { %2288 = vmatprep.subr.mxu1 %v2589_v0  ;;  %2304 = vmatpush3.msra.mxu0 %v2645_v2 }
 0x822   :  { %2289 = vmatpush3.msra.mxu1 %v2731_v30  ;;  %2305 = vmatprep.subr.mxu0 %v2589_v0 }
 0x823   :  { %2290 = vmatprep.subr.mxu1 %v2589_v0  ;;  %2306 = vmatpush3.msra.mxu0 %v2659_v5 }
 0x824   :  { %2291 = vmatpush3.msra.mxu1 %v2742_v32  ;;  %2307 = vmatprep.subr.mxu0 %v2589_v0 }
 0x825   :  { %2292 = vmatprep.subr.mxu1 %v2589_v0  ;;  %2308 = vmatpush3.msra.mxu0 %v2667_v6 }
 0x826   :  { %2293 = vmatpush3.msra.mxu1 %v2753_v34  ;;  %2309 = vmatprep.subr.mxu0 %v2589_v0 }
 0x827   :  { %2294 = vmatprep.subr.mxu1 %v2589_v0  ;;  %2310 = vmatpush3.msra.mxu0 %v2675_v7 }
 0x828   :  { %2295 = vmatpush3.msra.mxu1 %v2765_v37  ;;  %2311 = vmatprep.mubr.msk.f32.mxu0 %vm2590_vm2, %v2589_v0 }
 0x829   :  { %2296 = vmatprep.subr.mxu1 %v2589_v0  ;;  %2314 = vmatprep.subr.mxu0 %v2589_v0 }
 0x82a   :  { %2297 = vmatpush3.msra.mxu1 %v2773_v38 }
 0x82b   :  { %2298 = vmatprep.subr.mxu1 %v2589_v0 }
 0x82c   :  { %2299 = vmatpush3.msra.mxu1 %v2782_v39 }
 0x82d   :  { %2333 = vmatprep.subr.mxu1 %v2589_v0 }
 0x8dd   :  { %v876_v22 = vpop.f32.mrf.mxu1 }
 0x8de   :  { %v880_v23 = vadd.f32 %v876_v22, %v158_v21 }
 0x8df   :  { %v2283_v24 = vpop.f32.mrf.mxu1 }
 0x8e0   :  { %2487 = vtanh.f32 %v880_v23  ;;  %v780_v26 = vpop.f32.mrf.mxu0  ;;  %v2008_v36 = vmul.f32 -1.442695, %v880_v23 }
 0x8e1   :  { %v781_v29 = vadd.f32 %v2837_v51, %v780_v26 }
 0x8e2   :  { %v2272_v31 = vpop.f32.mrf.mxu0 }
 0x8e3   :  { %2489 = vtanh.f32 %v781_v29  ;;  %v2006_v40 = vmul.f32 -1.442695, %v781_v29 }
 0x8e4   :  { %2491 = vpow2.f32 %v2008_v36 }
 0x8e5   :  { %2493 = vpow2.f32 %v2006_v40 }
 0x8ed   :  { %v2488_v33 = vpop.eup %2487 }
 0x8ee   :  { %890 = vrot.lane.b32.xlu1 %v2488_v33, %s2591_s20 }
 0x8f0   :  { %v2490_v35 = vpop.eup %2489 }
 0x8f1   :  { %793 = vrot.lane.b32.xlu0 %v2490_v35, %s2591_s20  ;;  %v2492_v44 = vpop.eup %2491 }
 0x8f2   :  { %v884_v41 = vadd.f32 1.0, %v2492_v44  ;;  %v2494_v42 = vpop.eup %2493 }
 0x8f3   :  { %v787_v43 = vadd.f32 1.0, %v2494_v42 }
 0x8f4   :  { %2495 = vrcp.f32 %v884_v41 }
 0x8f5   :  { %2497 = vrcp.f32 %v787_v43 }
 0x901   :  { %v2496_v49 = vpop.eup %2495 }
 0x902   :  { %v2498_v54 = vpop.eup %2497  ;;  %v888_v56 = vmul.f32 %v2496_v49, %v2897_v4 }
 0x903   :  { %v791_v59 = vmul.f32 %v2498_v54, %v2901_v11 }
 0x960   :  { %v891_v52 = vpop.permute.xlu1 %890 }
 0x961   :  { %v893_v53 = vmul.f32 %v2496_v49, %v891_v52 }
 0x963   :  { %895 = vrot.lane.b32.xlu1 %v893_v53, %s2592_s21  ;;  %v794_v45 = vpop.permute.xlu0 %793 }
 0x964   :  { %v796_v55 = vmul.f32 %v2498_v54, %v794_v45 }
 0x966   :  { %798 = vrot.lane.b32.xlu0 %v796_v55, %s2592_s21 }
 0x9d5   :  { %v896_v57 = vpop.permute.xlu1 %895 }
 0x9d6   :  { %v2950_v58 = vadd.f32 %v896_v57, %v888_v56 }
 0x9d8   :  { %2499 = vtanh.f32 %v2950_v58  ;;  %v799_v60 = vpop.permute.xlu0 %798 }
 0x9d9   :  { %v2954_v61 = vadd.f32 %v799_v60, %v791_v59 }
 0x9db   :  { %2501 = vtanh.f32 %v2954_v61 }
 0x9e5   :  { %v2500_v62 = vpop.eup %2499 }
 0x9e6   :  { %901 = vrot.lane.b32.xlu1 %v2500_v62, %s2591_s20 }
 0x9e8   :  { %v2502_v63 = vpop.eup %2501 }
 0x9e9   :  { %804 = vrot.lane.b32.xlu0 %v2502_v63, %s2591_s20 }
 0xa58   :  { %v902_v1 = vpop.permute.xlu1 %901 }
 0xa59   :  { %v904_v3 = vmul.f32 %v2496_v49, %v902_v1 }
 0xa5b   :  { %906 = vrot.lane.b32.xlu0 %v904_v3, %s2592_s21  ;;  %v805_v4 = vpop.permute.xlu0 %804 }
 0xa5c   :  { %v2960_v8 = vmul.f32 %v2498_v54, %v805_v4 }
 0xa5e   :  { %910 = vrot.lane.b32.xlu1 %v2960_v8, %s2591_s20 }
 0xacd   :  { %v907_v10 = vpop.permute.xlu0 %906 }
 0xace   :  { %2312 = vmatmul.mubr.msk.f32.vlgmr.msra.gmra.mxu0 %vm200_vm3, %v907_v10 }
 0xacf   :  { %2315 = vmatpush3.msra.mxu0 %v2714_v27  ;;  %2330 = vmatprep.mubr.msk.f32.mxu0 %vm2590_vm2, %v2589_v0 }
 0xad0   :  { %2316 = vmatprep.subr.mxu0 %v2589_v0  ;;  %v911_v11 = vpop.permute.xlu1 %910 }
 0xad1   :  { %2317 = vmatpush3.msra.mxu0 %v2720_v28  ;;  %v913_v12 = vsel %vm200_vm3, %v907_v10, %v911_v11 }
 0xad2   :  { %2318 = vmatprep.subr.mxu0 %v2589_v0  ;;  %2301 = vmatmul.mubr.msk.f32.vlgmr.msra.gmra.mxu1 %vm304_vm4, %v913_v12 }
 0xad3   :  { %2319 = vmatpush3.msra.mxu0 %v2731_v30  ;;  %2334 = vmatpush3.msra.mxu1 %v2645_v2 }
 0xad4   :  { %2320 = vmatprep.subr.mxu0 %v2589_v0  ;;  %2335 = vmatprep.subr.mxu1 %v2589_v0 }
 0xad5   :  { %2321 = vmatpush3.msra.mxu0 %v2742_v32  ;;  %2336 = vmatpush3.msra.mxu1 %v2659_v5 }
 0xad6   :  { %2322 = vmatprep.subr.mxu0 %v2589_v0  ;;  %2337 = vmatprep.subr.mxu1 %v2589_v0 }
 0xad7   :  { %2323 = vmatpush3.msra.mxu0 %v2753_v34  ;;  %2338 = vmatpush3.msra.mxu1 %v2667_v6 }
 0xad8   :  { %2324 = vmatprep.subr.mxu0 %v2589_v0  ;;  %2339 = vmatprep.subr.mxu1 %v2589_v0 }
 0xad9   :  { %2341 = vmatprep.mubr.msk.f32.mxu1 %vm2590_vm2, %v2589_v0  ;;  %2340 = vmatpush3.msra.mxu1 %v2675_v7 }
 0xada   :  { %2325 = vmatpush3.msra.mxu0 %v2765_v37  ;;  %2344 = vmatprep.subr.mxu1 %v2589_v0 }
 0xadb   :  { %2326 = vmatprep.subr.mxu0 %v2589_v0 }
 0xadc   :  { %2327 = vmatpush3.msra.mxu0 %v2773_v38 }
 0xadd   :  { %2328 = vmatprep.subr.mxu0 %v2589_v0 }
 0xade   :  { %2329 = vmatpush3.msra.mxu0 %v2782_v39 }
 0xadf   :  { %2363 = vmatprep.subr.mxu0 %v2589_v0 }
 0xb8e   :  { %v1079_v14 = vpop.f32.mrf.mxu0 }
 0xb8f   :  { %v1083_v15 = vadd.f32 %v1079_v14, %v163_v13 }
 0xb90   :  { %v2313_v16 = vpop.f32.mrf.mxu0 }
 0xb91   :  { %2503 = vtanh.f32 %v1083_v15  ;;  %v2012_v23 = vmul.f32 -1.442695, %v1083_v15 }
 0xb92   :  { %v983_v18 = vpop.f32.mrf.mxu1 }
 0xb93   :  { %v984_v19 = vadd.f32 %v2837_v51, %v983_v18 }
 0xb94   :  { %v2302_v20 = vpop.f32.mrf.mxu1 }
 0xb95   :  { %2505 = vtanh.f32 %v984_v19  ;;  %v2010_v24 = vmul.f32 -1.442695, %v984_v19 }
 0xb96   :  { %2507 = vpow2.f32 %v2012_v23 }
 0xb97   :  { %2509 = vpow2.f32 %v2010_v24 }
 0xb9e   :  { %v2504_v21 = vpop.eup %2503 }
 0xb9f   :  { %1093 = vrot.lane.b32.xlu1 %v2504_v21, %s2591_s20 }
 0xba2   :  { %v2506_v22 = vpop.eup %2505 }
 0xba3   :  { %996 = vrot.lane.b32.xlu0 %v2506_v22, %s2591_s20  ;;  %v2508_v47 = vpop.eup %2507 }
 0xba4   :  { %v1087_v26 = vadd.f32 1.0, %v2508_v47  ;;  %v2510_v29 = vpop.eup %2509 }
 0xba5   :  { %v990_v31 = vadd.f32 1.0, %v2510_v29 }
 0xba6   :  { %2511 = vrcp.f32 %v1087_v26 }
 0xba7   :  { %2513 = vrcp.f32 %v990_v31 }
 0xbb3   :  { %v2512_v33 = vpop.eup %2511 }
 0xbb4   :  { %v2514_v40 = vpop.eup %2513  ;;  %v1091_v42 = vmul.f32 %v2512_v33, %v2950_v58 }
 0xbb5   :  { %v994_v52 = vmul.f32 %v2514_v40, %v2954_v61 }
 0xc11   :  { %v1094_v35 = vpop.permute.xlu1 %1093 }
 0xc12   :  { %v1096_v36 = vmul.f32 %v2512_v33, %v1094_v35 }
 0xc14   :  { %1098 = vrot.lane.b32.xlu1 %v1096_v36, %s2592_s21 }
 0xc15   :  { %v997_v44 = vpop.permute.xlu0 %996 }
 0xc16   :  { %v999_v41 = vmul.f32 %v2514_v40, %v997_v44 }
 0xc18   :  { %1001 = vrot.lane.b32.xlu0 %v999_v41, %s2592_s21 }
 0xc86   :  { %v1099_v43 = vpop.permute.xlu1 %1098 }
 0xc87   :  { %v3003_v49 = vadd.f32 %v1099_v43, %v1091_v42 }
 0xc89   :  { %2515 = vtanh.f32 %v3003_v49 }
 0xc8a   :  { %v1002_v53 = vpop.permute.xlu0 %1001 }
 0xc8b   :  { %v3007_v54 = vadd.f32 %v1002_v53, %v994_v52 }
 0xc8d   :  { %2517 = vtanh.f32 %v3007_v54 }
 0xc96   :  { %v2516_v45 = vpop.eup %2515 }
 0xc97   :  { %1104 = vrot.lane.b32.xlu1 %v2516_v45, %s2591_s20 }
 0xc9a   :  { %v2518_v55 = vpop.eup %2517 }
 0xc9b   :  { %1007 = vrot.lane.b32.xlu0 %v2518_v55, %s2591_s20 }
 0xd09   :  { %v1105_v56 = vpop.permute.xlu1 %1104 }
 0xd0a   :  { %v1107_v57 = vmul.f32 %v2512_v33, %v1105_v56 }
 0xd0c   :  { %1109 = vrot.lane.b32.xlu0 %v1107_v57, %s2592_s21 }
 0xd0d   :  { %v1008_v58 = vpop.permute.xlu0 %1007 }
 0xd0e   :  { %v3013_v59 = vmul.f32 %v2514_v40, %v1008_v58 }
 0xd10   :  { %1113 = vrot.lane.b32.xlu1 %v3013_v59, %s2591_s20 }
 0xd7e   :  { %v1110_v60 = vpop.permute.xlu0 %1109 }
 0xd7f   :  { %2342 = vmatmul.mubr.msk.f32.vlgmr.msra.gmra.mxu1 %vm200_vm3, %v1110_v60 }
 0xd80   :  { %2345 = vmatpush3.msra.mxu1 %v2714_v27  ;;  %2360 = vmatprep.mubr.msk.f32.mxu1 %vm2590_vm2, %v2589_v0 }
 0xd81   :  { %2346 = vmatprep.subr.mxu1 %v2589_v0 }
 0xd82   :  { %2347 = vmatpush3.msra.mxu1 %v2720_v28  ;;  %v1114_v61 = vpop.permute.xlu1 %1113 }
 0xd83   :  { %2348 = vmatprep.subr.mxu1 %v2589_v0  ;;  %v1116_v62 = vsel %vm200_vm3, %v1110_v60, %v1114_v61 }
 0xd84   :  { %2349 = vmatpush3.msra.mxu1 %v2731_v30  ;;  %2331 = vmatmul.mubr.msk.f32.vlgmr.msra.gmra.mxu0 %vm304_vm4, %v1116_v62 }
 0xd85   :  { %2350 = vmatprep.subr.mxu1 %v2589_v0  ;;  %2364 = vmatpush3.msra.mxu0 %v2645_v2  ;;  %v168_v2 = vadd.f32 %v2824_v46, %v2697_v9 }
 0xd86   :  { %2351 = vmatpush3.msra.mxu1 %v2742_v32  ;;  %2365 = vmatprep.subr.mxu0 %v2589_v0 }
 0xd87   :  { %2352 = vmatprep.subr.mxu1 %v2589_v0  ;;  %2366 = vmatpush3.msra.mxu0 %v2659_v5 }
 0xd88   :  { %2353 = vmatpush3.msra.mxu1 %v2753_v34  ;;  %2367 = vmatprep.subr.mxu0 %v2589_v0 }
 0xd89   :  { %2371 = vmatprep.mubr.msk.f32.mxu0 %vm2590_vm2, %v2589_v0  ;;  %2368 = vmatpush3.msra.mxu0 %v2667_v6 }
 0xd8a   :  { %2354 = vmatprep.subr.mxu1 %v2589_v0  ;;  %2369 = vmatprep.subr.mxu0 %v2589_v0 }
 0xd8b   :  { %2355 = vmatpush3.msra.mxu1 %v2765_v37  ;;  %2370 = vmatpush3.msra.mxu0 %v2675_v7 }
 0xd8c   :  { %2356 = vmatprep.subr.mxu1 %v2589_v0  ;;  %2374 = vmatprep.subr.mxu0 %v2589_v0 }
 0xd8d   :  { %2357 = vmatpush3.msra.mxu1 %v2773_v38 }
 0xd8e   :  { %2358 = vmatprep.subr.mxu1 %v2589_v0 }
 0xd8f   :  { %2359 = vmatpush3.msra.mxu1 %v2782_v39 }
 0xd90   :  { %2393 = vmatprep.subr.mxu1 %v2589_v0 }
 0xe3f   :  { %v1282_v5 = vpop.f32.mrf.mxu1 }
 0xe40   :  { %v1286_v6 = vadd.f32 %v1282_v5, %v168_v2 }
 0xe41   :  { %v2343_v63 = vpop.f32.mrf.mxu1 }
 0xe42   :  { %2519 = vtanh.f32 %v1286_v6  ;;  %v2016_v11 = vmul.f32 -1.442695, %v1286_v6 }
 0xe44   :  { %v1186_v7 = vpop.f32.mrf.mxu0 }
 0xe45   :  { %v1187_v1 = vadd.f32 %v2837_v51, %v1186_v7 }
 0xe46   :  { %v2332_v3 = vpop.f32.mrf.mxu0 }
 0xe47   :  { %2521 = vtanh.f32 %v1187_v1  ;;  %v2014_v12 = vmul.f32 -1.442695, %v1187_v1 }
 0xe48   :  { %2523 = vpow2.f32 %v2016_v11 }
 0xe49   :  { %2525 = vpow2.f32 %v2014_v12 }
 0xe4f   :  { %v2520_v4 = vpop.eup %2519 }
 0xe50   :  { %1296 = vrot.lane.b32.xlu1 %v2520_v4, %s2591_s20 }
 0xe54   :  { %v2522_v10 = vpop.eup %2521 }
 0xe55   :  { %1199 = vrot.lane.b32.xlu0 %v2522_v10, %s2591_s20  ;;  %v2524_v46 = vpop.eup %2523 }
 0xe56   :  { %v1290_v13 = vadd.f32 1.0, %v2524_v46  ;;  %v2526_v14 = vpop.eup %2525 }
 0xe57   :  { %v1193_v15 = vadd.f32 1.0, %v2526_v14 }
 0xe58   :  { %2527 = vrcp.f32 %v1290_v13 }
 0xe59   :  { %2529 = vrcp.f32 %v1193_v15 }
 0xe65   :  { %v2528_v16 = vpop.eup %2527 }
 0xe66   :  { %v2530_v20 = vpop.eup %2529  ;;  %v1294_v23 = vmul.f32 %v2528_v16, %v3003_v49 }
 0xe67   :  { %v1197_v26 = vmul.f32 %v2530_v20, %v3007_v54 }
 0xec2   :  { %v1297_v18 = vpop.permute.xlu1 %1296 }
 0xec3   :  { %v1299_v19 = vmul.f32 %v2528_v16, %v1297_v18 }
 0xec5   :  { %1301 = vrot.lane.b32.xlu1 %v1299_v19, %s2592_s21  ;;  %v2579_v19 = vld [vmem:[%s3262_s4 + $0x38] sm:$0xff] }
 0xec7   :  { %v1200_v21 = vpop.permute.xlu0 %1199 }
 0xec8   :  { %v1202_v22 = vmul.f32 %v2530_v20, %v1200_v21  ;;  %v2581_v21 = vld [vmem:[%s3262_s4 + $0x28] sm:$0xff] }
 0xeca   :  { %1204 = vrot.lane.b32.xlu0 %v1202_v22, %s2592_s21 }
 0xf37   :  { %v1302_v24 = vpop.permute.xlu1 %1301 }
 0xf38   :  { %v3056_v47 = vadd.f32 %v1302_v24, %v1294_v23  ;;  %v2582_v24 = vld [vmem:[%s3262_s4 + $0x20] sm:$0xff] }
 0xf3a   :  { %2531 = vtanh.f32 %v3056_v47 }
 0xf3c   :  { %v1205_v29 = vpop.permute.xlu0 %1204 }
 0xf3d   :  { %v3060_v31 = vadd.f32 %v1205_v29, %v1197_v26  ;;  %v2584_v26 = vld [vmem:[%s3262_s4 + $0x10] sm:$0xff]  ;;  %v2585_v29 = vld [vmem:[%s3262_s4 + $0x8] sm:$0xff] }
 0xf3f   :  { %2533 = vtanh.f32 %v3060_v31 }
 0xf47   :  { %v2532_v33 = vpop.eup %2531 }
 0xf48   :  { %1307 = vrot.lane.b32.xlu1 %v2532_v33, %s2591_s20  ;;  %v2587_v33 = vld [vmem:[%s3261_s3] ss:$0 sm:$0xff] }
 0xf4c   :  { %v2534_v35 = vpop.eup %2533 }
 0xf4d   :  { %1210 = vrot.lane.b32.xlu0 %v2534_v35, %s2591_s20  ;;  %v178_v35 = vadd.f32 %v2587_v33, %v2828_v48 }
 0xfba   :  { %v1308_v36 = vpop.permute.xlu1 %1307 }
 0xfbb   :  { %v1310_v40 = vmul.f32 %v2528_v16, %v1308_v36 }
 0xfbd   :  { %1312 = vrot.lane.b32.xlu0 %v1310_v40, %s2592_s21 }
 0xfbf   :  { %v1211_v44 = vpop.permute.xlu0 %1210 }
 0xfc0   :  { %v3066_v41 = vmul.f32 %v2530_v20, %v1211_v44  ;;  %v2580_v20 = vld [vmem:[%s3262_s4 + $0x30] sm:$0xff] }
 0xfc2   :  { %1316 = vrot.lane.b32.xlu1 %v3066_v41, %s2591_s20 }
0x102f   :  { %v1313_v42 = vpop.permute.xlu0 %1312 }
0x1030   :  { %2372 = vmatmul.mubr.msk.f32.vlgmr.msra.gmra.mxu0 %vm200_vm3, %v1313_v42 }
0x1031   :  { %2375 = vmatpush3.msra.mxu0 %v2714_v27  ;;  %2390 = vmatprep.mubr.msk.f32.mxu0 %vm2590_vm2, %v2589_v0  ;;  %v2575_v27 = vld [vmem:[%s3259_s2 + $0x18] sm:$0xff] }
0x1032   :  { %2376 = vmatprep.subr.mxu0 %v2589_v0 }
0x1033   :  { %2377 = vmatpush3.msra.mxu0 %v2720_v28  ;;  %v2576_v28 = vld [vmem:[%s3259_s2 + $0x10] sm:$0xff] }
0x1034   :  { %2378 = vmatprep.subr.mxu0 %v2589_v0  ;;  %v1317_v43 = vpop.permute.xlu1 %1316 }
0x1035   :  { %2379 = vmatpush3.msra.mxu0 %v2731_v30  ;;  %v1319_v49 = vsel %vm200_vm3, %v1313_v42, %v1317_v43  ;;  %v2577_v30 = vld [vmem:[%s3259_s2 + $0x8] sm:$0xff] }
0x1036   :  { %2380 = vmatprep.subr.mxu0 %v2589_v0  ;;  %2361 = vmatmul.mubr.msk.f32.vlgmr.msra.gmra.mxu1 %vm304_vm4, %v1319_v49 }
0x1037   :  { %2381 = vmatpush3.msra.mxu0 %v2742_v32  ;;  %2394 = vmatpush3.msra.mxu1 %v2575_v27  ;;  %v2578_v32 = vld [vmem:[%s3259_s2] sm:$0xff] }
0x1038   :  { %2382 = vmatprep.subr.mxu0 %v2589_v0  ;;  %2395 = vmatprep.subr.mxu1 %v2589_v0 }
0x1039   :  { %2401 = vmatprep.mubr.msk.f32.mxu1 %vm2590_vm2, %v2589_v0  ;;  %2396 = vmatpush3.msra.mxu1 %v2576_v28 }
0x103a   :  { %2383 = vmatpush3.msra.mxu0 %v2753_v34  ;;  %2397 = vmatprep.subr.mxu1 %v2589_v0  ;;  %v173_v34 = vadd.f32 %v2697_v9, %v2832_v50 }
0x103b   :  { %2384 = vmatprep.subr.mxu0 %v2589_v0  ;;  %2398 = vmatpush3.msra.mxu1 %v2577_v30 }
0x103c   :  { %2385 = vmatpush3.msra.mxu0 %v2765_v37  ;;  %2399 = vmatprep.subr.mxu1 %v2589_v0 }
0x103d   :  { %2386 = vmatprep.subr.mxu0 %v2589_v0  ;;  %2400 = vmatpush3.msra.mxu1 %v2578_v32 }
0x103e   :  { %2387 = vmatpush3.msra.mxu0 %v2773_v38  ;;  %2404 = vmatprep.subr.mxu1 %v2589_v0 }
0x103f   :  { %2388 = vmatprep.subr.mxu0 %v2589_v0 }
0x1040   :  { %2389 = vmatpush3.msra.mxu0 %v2782_v39 }
0x10f0   :  { %v1485_v37 = vpop.f32.mrf.mxu0 }
0x10f1   :  { %v1489_v52 = vadd.f32 %v1485_v37, %v173_v34 }
0x10f2   :  { %v2373_v53 = vpop.f32.mrf.mxu0 }
0x10f3   :  { %2535 = vtanh.f32 %v1489_v52  ;;  %v2020_v57 = vmul.f32 -1.442695, %v1489_v52 }
0x10f6   :  { %v1389_v54 = vpop.f32.mrf.mxu1 }
0x10f7   :  { %v1390_v45 = vadd.f32 %v2837_v51, %v1389_v54 }
0x10f8   :  { %v2362_v55 = vpop.f32.mrf.mxu1 }
0x10f9   :  { %2537 = vtanh.f32 %v1390_v45  ;;  %v2018_v39 = vmul.f32 -1.442695, %v1390_v45 }
0x10fa   :  { %2539 = vpow2.f32 %v2020_v57 }
0x10fb   :  { %2541 = vpow2.f32 %v2018_v39 }
0x1100   :  { %v2536_v56 = vpop.eup %2535 }
0x1101   :  { %1499 = vrot.lane.b32.xlu1 %v2536_v56, %s2591_s20 }
0x1106   :  { %v2538_v38 = vpop.eup %2537 }
0x1107   :  { %1402 = vrot.lane.b32.xlu0 %v2538_v38, %s2591_s20  ;;  %v2540_v9 = vpop.eup %2539 }
0x1108   :  { %v1493_v50 = vadd.f32 1.0, %v2540_v9  ;;  %v2542_v58 = vpop.eup %2541 }
0x1109   :  { %v1396_v60 = vadd.f32 1.0, %v2542_v58 }
0x110a   :  { %2543 = vrcp.f32 %v1493_v50 }
0x110b   :  { %2545 = vrcp.f32 %v1396_v60 }
0x1117   :  { %v2544_v61 = vpop.eup %2543 }
0x1118   :  { %v2546_v5 = vpop.eup %2545  ;;  %v1497_v7 = vmul.f32 %v2544_v61, %v3056_v47  ;;  %v2583_v47 = vld [vmem:[%s3262_s4 + $0x18] sm:$0xff] }
0x1119   :  { %v1400_v4 = vmul.f32 %v2546_v5, %v3060_v31  ;;  %v2586_v31 = vld [vmem:[%s3262_s4] sm:$0xff] }
0x1173   :  { %v1500_v62 = vpop.permute.xlu1 %1499 }
0x1174   :  { %v1502_v2 = vmul.f32 %v2544_v61, %v1500_v62 }
0x1176   :  { %1504 = vrot.lane.b32.xlu1 %v1502_v2, %s2592_s21 }
0x1179   :  { %v1403_v6 = vpop.permute.xlu0 %1402 }
0x117a   :  { %v1405_v63 = vmul.f32 %v2546_v5, %v1403_v6 }
0x117c   :  { %1407 = vrot.lane.b32.xlu0 %v1405_v63, %s2592_s21 }
0x11e8   :  { %v1505_v1 = vpop.permute.xlu1 %1504 }
0x11e9   :  { %v3116_v3 = vadd.f32 %v1505_v1, %v1497_v7 }
0x11eb   :  { %2547 = vtanh.f32 %v3116_v3 }
0x11ee   :  { %v1408_v10 = vpop.permute.xlu0 %1407 }
0x11ef   :  { %v3120_v11 = vadd.f32 %v1408_v10, %v1400_v4 }
0x11f1   :  { %2549 = vtanh.f32 %v3120_v11 }
0x11f8   :  { %v2548_v12 = vpop.eup %2547 }
0x11f9   :  { %1510 = vrot.lane.b32.xlu1 %v2548_v12, %s2591_s20 }
0x11fe   :  { %v2550_v46 = vpop.eup %2549 }
0x11ff   :  { %1413 = vrot.lane.b32.xlu0 %v2550_v46, %s2591_s20 }
0x126b   :  { %v1511_v13 = vpop.permute.xlu1 %1510 }
0x126c   :  { %v1513_v14 = vmul.f32 %v2544_v61, %v1511_v13 }
0x126e   :  { %1515 = vrot.lane.b32.xlu0 %v1513_v14, %s2592_s21 }
0x1271   :  { %v1414_v15 = vpop.permute.xlu0 %1413 }
0x1272   :  { %v3126_v16 = vmul.f32 %v2546_v5, %v1414_v15 }
0x1274   :  { %1519 = vrot.lane.b32.xlu1 %v3126_v16, %s2591_s20 }
0x12e0   :  { %v1516_v18 = vpop.permute.xlu0 %1515 }
0x12e1   :  { %2402 = vmatmul.mubr.msk.f32.vlgmr.msra.gmra.mxu1 %vm200_vm3, %v1516_v18 }
0x12e2   :  { %2405 = vmatpush3.msra.mxu1 %v2579_v19  ;;  %2420 = vmatprep.mubr.msk.f32.mxu1 %vm2590_vm2, %v2589_v0  ;;  %v1826_v19 = vld [vmem:[%s3264_s6 + $0x18] sm:$0xff] }
0x12e3   :  { %2406 = vmatprep.subr.mxu1 %v2589_v0  ;;  %2423 = vmatprep.subr.mxu0 %v1826_v19 }
0x12e4   :  { %2407 = vmatpush3.msra.mxu1 %v2580_v20  ;;  %v1825_v20 = vld [vmem:[%s3264_s6 + $0x10] sm:$0xff] }
0x12e5   :  { %2408 = vmatprep.subr.mxu1 %v2589_v0 }
0x12e6   :  { %2409 = vmatpush3.msra.mxu1 %v2581_v21  ;;  %v1520_v22 = vpop.permute.xlu1 %1519 }
0x12e7   :  { %2410 = vmatprep.subr.mxu1 %v2589_v0  ;;  %v1522_v23 = vsel %vm200_vm3, %v1516_v18, %v1520_v22 }
0x12e8   :  { %2411 = vmatpush3.msra.mxu1 %v2582_v24  ;;  %2391 = vmatmul.mubr.msk.f32.vlgmr.msra.gmra.mxu0 %vm304_vm4, %v1522_v23  ;;  %v1823_v23 = vld [vmem:[%s3264_s6] sm:$0xff] }
0x12e9   :  { %2412 = vmatprep.subr.mxu1 %v2589_v0  ;;  %2424 = vmatpush3.msra.mxu0 %v1826_v19 }
0x12ea   :  { %2413 = vmatpush3.msra.mxu1 %v2583_v47  ;;  %2425 = vmatprep.subr.mxu0 %v1825_v20  ;;  %v13_v47 = vstv %s3265_s7 }
0x12eb   :  { %2414 = vmatprep.subr.mxu1 %v2589_v0  ;;  %2426 = vmatpush3.msra.mxu0 %v1825_v20  ;;  %14 = vst [vmem:[#allocation2] sm:$0x1] %v13_v47 }
0x12ec   :  { %2415 = vmatpush3.msra.mxu1 %v2584_v26 }
0x12ed   :  { %2416 = vmatprep.subr.mxu1 %v2589_v0 }
0x12ee   :  { %2417 = vmatpush3.msra.mxu1 %v2585_v29 }
0x12ef   :  { %2418 = vmatprep.subr.mxu1 %v2589_v0 }
0x12f0   :  { %2419 = vmatpush3.msra.mxu1 %v2586_v31 }
0x13a1   :  { %v1688_v36 = vpop.f32.mrf.mxu1 }
0x13a2   :  { %v1692_v40 = vadd.f32 %v1688_v36, %v178_v35 }
0x13a3   :  { %v2403_v44 = vpop.f32.mrf.mxu1 }
0x13a4   :  { %2551 = vtanh.f32 %v1692_v40  ;;  %v2024_v28 = vmul.f32 -1.442695, %v1692_v40  ;;  %v2027_v40 = vld [vmem:[#allocation2] ss:$0 sm:$0xff] }
0x13a8   :  { %v1592_v42 = vpop.f32.mrf.mxu0 }
0x13a9   :  { %v1593_v43 = vadd.f32 %v2837_v51, %v1592_v42 }
0x13aa   :  { %v2392_v49 = vpop.f32.mrf.mxu0 }
0x13ab   :  { %2553 = vtanh.f32 %v1593_v43  ;;  %v2022_v30 = vmul.f32 -1.442695, %v1593_v43 }
0x13ac   :  { %2555 = vpow2.f32 %v2024_v28 }
0x13ad   :  { %2557 = vpow2.f32 %v2022_v30 }
0x13b1   :  { %v2552_v0 = vpop.eup %2551 }
0x13b2   :  { %1702 = vrot.lane.b32.xlu1 %v2552_v0, %s2591_s20 }
0x13b8   :  { %v2554_v27 = vpop.eup %2553 }
0x13b9   :  { %1605 = vrot.lane.b32.xlu0 %v2554_v27, %s2591_s20  ;;  %v2556_v48 = vpop.eup %2555 }
0x13ba   :  { %v1696_v32 = vadd.f32 1.0, %v2556_v48  ;;  %v2558_v34 = vpop.eup %2557 }
0x13bb   :  { %v1599_v37 = vadd.f32 1.0, %v2558_v34 }
0x13bc   :  { %2559 = vrcp.f32 %v1696_v32 }
0x13bd   :  { %2561 = vrcp.f32 %v1599_v37 }
0x13c9   :  { %v2560_v52 = vpop.eup %2559 }
0x13ca   :  { %v2562_v54 = vpop.eup %2561  ;;  %v1700_v56 = vmul.f32 %v2560_v52, %v3116_v3  ;;  %v2588_v3 = vld [vmem:[%s3263_s5] ss:$0 sm:$0xff] }
0x13cb   :  { %v1603_v39 = vmul.f32 %v2562_v54, %v3120_v11 }
0x1424   :  { %v1703_v51 = vpop.permute.xlu1 %1702 }
0x1425   :  { %v1705_v53 = vmul.f32 %v2560_v52, %v1703_v51 }
0x1427   :  { %1707 = vrot.lane.b32.xlu1 %v1705_v53, %s2592_s21 }
0x142b   :  { %v1606_v45 = vpop.permute.xlu0 %1605 }
0x142c   :  { %v1608_v55 = vmul.f32 %v2562_v54, %v1606_v45 }
0x142e   :  { %1610 = vrot.lane.b32.xlu0 %v1608_v55, %s2592_s21 }
0x1499   :  { %v1708_v38 = vpop.permute.xlu1 %1707 }
0x149a   :  { %v1710_v57 = vadd.f32 %v1708_v38, %v1700_v56 }
0x149c   :  { %2563 = vtanh.f32 %v1710_v57 }
0x14a0   :  { %v1611_v9 = vpop.permute.xlu0 %1610 }
0x14a1   :  { %v1613_v50 = vadd.f32 %v1611_v9, %v1603_v39 }
0x14a3   :  { %2565 = vtanh.f32 %v1613_v50 }
0x14a9   :  { %v2564_v58 = vpop.eup %2563 }
0x14aa   :  { %1713 = vrot.lane.b32.xlu1 %v2564_v58, %s2591_s20 }
0x14b0   :  { %v2566_v60 = vpop.eup %2565 }
0x14b1   :  { %1616 = vrot.lane.b32.xlu0 %v2566_v60, %s2591_s20 }
0x151c   :  { %v1714_v61 = vpop.permute.xlu1 %1713 }
0x151d   :  { %v1716_v62 = vmul.f32 %v2560_v52, %v1714_v61 }
0x151f   :  { %1718 = vrot.lane.b32.xlu0 %v1716_v62, %s2592_s21 }
0x1523   :  { %v1617_v2 = vpop.permute.xlu0 %1616 }
0x1524   :  { %v1619_v5 = vmul.f32 %v2562_v54, %v1617_v2 }
0x1526   :  { %1722 = vrot.lane.b32.xlu1 %v1619_v5, %s2591_s20 }
0x1591   :  { %v1719_v6 = vpop.permute.xlu0 %1718 }
0x1598   :  { %v1723_v63 = vpop.permute.xlu1 %1722 }
0x1599   :  { %v1725_v7 = vsel %vm200_vm3, %v1719_v6, %v1723_v63 }
0x159a   :  { %2421 = vmatmul.mubr.msk.f32.vlgmr.msra.gmra.mxu1 %vm304_vm4, %v1725_v7 }
0x165a   :  { %v1795_v1 = vpop.f32.mrf.mxu1 }
0x165b   :  { %v1796_v4 = vadd.f32 %v2588_v3, %v1795_v1 }
0x165c   :  { %v2422_v10 = vpop.f32.mrf.mxu1 }
0x165d   :  { %2567 = vtanh.f32 %v1796_v4  ;;  %v2026_v12 = vmul.f32 -1.442695, %v1796_v4 }
0x165f   :  { %2569 = vpow2.f32 %v2026_v12 }
0x166a   :  { %v2568_v11 = vpop.eup %2567 }
0x166b   :  { %1808 = vrot.lane.b32.xlu0 %v2568_v11, %s2591_s20 }
0x166c   :  { %v2570_v46 = vpop.eup %2569 }
0x166d   :  { %v1802_v13 = vadd.f32 1.0, %v2570_v46 }
0x166f   :  { %2571 = vrcp.f32 %v1802_v13 }
0x167c   :  { %v2572_v14 = vpop.eup %2571 }
0x16dd   :  { %v1809_v15 = vpop.permute.xlu0 %1808 }
0x16de   :  { %v1811_v18 = vmul.f32 %v2572_v14, %v1809_v15 }
0x16e0   :  { %1813 = vrot.lane.b32.xlu1 %v1811_v18, %s2592_s21 }
0x16e4   :  { %1835 = vrot.lane.b32.xlu1 %v2853_v25, %s2592_s21  ;;  %v1806_v25 = vmul.f32 %v2572_v14, %v1613_v50 }
0x16e8   :  { %1839 = vrot.lane.b32.xlu1 %v2960_v8, %s2592_s21 }
0x16ec   :  { %1843 = vrot.lane.b32.xlu1 %v3066_v41, %s2592_s21  ;;  %v1824_v41 = vld [vmem:[%s3264_s6 + $0x8] sm:$0xff] }
0x16ed   :  { %2427 = vmatprep.subr.mxu0 %v1824_v41 }
0x16ee   :  { %2428 = vmatpush3.msra.mxu0 %v1824_v41 }
0x16ef   :  { %2429 = vmatprep.subr.mxu0 %v1823_v23 }
0x16f0   :  { %1847 = vrot.lane.b32.xlu1 %v1619_v5, %s2592_s21  ;;  %2430 = vmatpush3.msra.mxu0 %v1823_v23 }
0x1752   :  { %v1814_v21 = vpop.permute.xlu1 %1813 }
0x1753   :  { %v1816_v8 = vadd.f32 %v1814_v21, %v1806_v25 }
0x1755   :  { %2573 = vtanh.f32 %v1816_v8 }
0x1756   :  { %v1836_v22 = vpop.permute.xlu1 %1835 }
0x1757   :  { %2431 = vmatprep.mubr.msk.f32.mxu0 %vm200_vm3, %v1836_v22 }
0x175a   :  { %v1840_v29 = vpop.permute.xlu1 %1839 }
0x1762   :  { %v2574_v24 = vpop.eup %2573 }
0x1763   :  { %1819 = vrot.lane.b32.xlu0 %v2574_v24, %s2591_s20 }
0x1767   :  { %1837 = vrot.lane.b32.xlu0 %v2907_v17, %s2592_s21  ;;  %v1844_v17 = vpop.permute.xlu1 %1843 }
0x176b   :  { %1841 = vrot.lane.b32.xlu0 %v3013_v59, %s2592_s21  ;;  %v1848_v35 = vpop.permute.xlu1 %1847 }
0x176f   :  { %1845 = vrot.lane.b32.xlu0 %v3126_v16, %s2592_s21 }
0x17d5   :  { %v1820_v26 = vpop.permute.xlu0 %1819 }
0x17d6   :  { %v1822_v31 = vmul.f32 %v2572_v14, %v1820_v26 }
0x17d8   :  { %1849 = vrot.lane.b32.xlu0 %v1822_v31, %s2592_s21 }
0x17d9   :  { %v1838_v33 = vpop.permute.xlu0 %1837 }
0x17da   :  { %2432 = vmatmul.mubr.msk.f32.vlgmr.msra.gmra.mxu0 %vm200_vm3, %v1838_v33 }
0x17db   :  { %2434 = vmatprep.mubr.msk.f32.mxu0 %vm200_vm3, %v1840_v29 }
0x17dd   :  { %v1842_v59 = vpop.permute.xlu0 %1841 }
0x17de   :  { %2435 = vmatmul.mubr.msk.f32.gmra.mxu0 %vm200_vm3, %v1842_v59 }
0x17df   :  { %2437 = vmatprep.mubr.msk.f32.mxu0 %vm200_vm3, %v1844_v17 }
0x17e1   :  { %v1846_v16 = vpop.permute.xlu0 %1845 }
0x17e2   :  { %2438 = vmatmul.mubr.msk.f32.gmra.mxu0 %vm200_vm3, %v1846_v16 }
0x17e3   :  { %2440 = vmatprep.mubr.msk.f32.mxu0 %vm200_vm3, %v1848_v35 }
0x184a   :  { %v1850_v36 = vpop.permute.xlu0 %1849 }
0x184b   :  { %2441 = vmatmul.mubr.msk.f32.gmra.mxu0 %vm200_vm3, %v1850_v36 }
0x189a   :  { %v2433_v44 = vpop.f32.mrf.mxu0 }
0x189b   :  { %v1939_v42 = vadd.f32 %v2433_v44, %v2027_v40 }
0x189c   :  { %v1933_v43 = vpop.f32.mrf.mxu0 }
0x189d   :  { %1974 = vst.msk [vmem:[%s3266_s8 + $0x8] sm:$0xff] %vm1972_vm5, %v1939_v42  ;;  %v1934_v49 = vadd.f32 %v2027_v40, %v1933_v43 }
0x189e   :  { %v2436_v0 = vpop.f32.mrf.mxu0 }
0x189f   :  { %1973 = vst.msk [vmem:[%s3266_s8] sm:$0xff] %vm1972_vm5, %v1934_v49  ;;  %v1949_v27 = vadd.f32 %v2436_v0, %v2027_v40 }
0x18a0   :  { %v1943_v28 = vpop.f32.mrf.mxu0 }
0x18a1   :  { %1976 = vst.msk [vmem:[%s3266_s8 + $0x18] sm:$0xff] %vm1972_vm5, %v1949_v27  ;;  %v1944_v30 = vadd.f32 %v2027_v40, %v1943_v28 }
0x18a2   :  { %v2439_v48 = vpop.f32.mrf.mxu0 }
0x18a3   :  { %1975 = vst.msk [vmem:[%s3266_s8 + $0x10] sm:$0xff] %vm1972_vm5, %v1944_v30  ;;  %v1959_v32 = vadd.f32 %v2439_v48, %v2027_v40 }
0x18a4   :  { %v1953_v34 = vpop.f32.mrf.mxu0 }
0x18a5   :  { %1978 = vst.msk [vmem:[%s3266_s8 + $0x28] sm:$0xff] %vm1972_vm5, %v1959_v32  ;;  %v1954_v37 = vadd.f32 %v2027_v40, %v1953_v34 }
0x18a7   :  { %1977 = vst.msk [vmem:[%s3266_s8 + $0x20] sm:$0xff] %vm1972_vm5, %v1954_v37 }
0x190b   :  { %v2442_v52 = vpop.f32.mrf.mxu0 }
0x190c   :  { %v1969_v51 = vadd.f32 %v2442_v52, %v2027_v40 }
0x190d   :  { %v1963_v53 = vpop.f32.mrf.mxu0 }
0x190e   :  { %1980 = vst.msk [vmem:[%s3266_s8 + $0x38] sm:$0xff] %vm1972_vm5, %v1969_v51  ;;  %v1964_v54 = vadd.f32 %v2027_v40, %v1963_v53 }
0x1910   :  { %1979 = vst.msk [vmem:[%s3266_s8 + $0x30] sm:$0xff] %vm1972_vm5, %v1964_v54 }

</bundles_post_ra>
